<compile_context>
chip_gen: v6e
topology: v6e:2x2x1
jax: 0.10.0
libtpu: 0.0.40
codegen_flags: <defaults>
</compile_context>

<pallas_src>
import functools

import jax
import jax.numpy as jnp
from jax.experimental import pallas as pl
from jax.experimental.pallas import tpu as pltpu

NEG_SLOPE = 0.01            # PyTorch nn.LeakyReLU default negative_slope
LANE = 128
SUBLANE = 8
TM_MAX = 512                # M-tile (rows) — 512 keeps double-buffered VMEM tiny
COMPUTE_DTYPE = jnp.bfloat16


def _round_up(x, m):
    return (x + m - 1) // m * m


# ----------------------------------------------------------------------------
# Pallas kernel: fused matmul + bias + activation (one M-tile per grid step)
# ----------------------------------------------------------------------------
def _matmul_bias_act_kernel(p_ref, w_ref, b_ref, o_ref, *, act):
    acc = jnp.dot(p_ref[...], w_ref[...], preferred_element_type=jnp.float32)
    acc = acc + b_ref[...]                         # (TM, Np) + (1, Np), f32
    if act == "leaky_relu":
        acc = jnp.where(acc >= 0, acc, NEG_SLOPE * acc)
    elif act == "sigmoid":
        # exp -> EUP, approx reciprocal -> EUP (keeps VALU free); clip is a
        # no-op for exact sigmoid, just guards the approx-recip rounding.
        acc = pl.reciprocal(1.0 + jnp.exp(-acc), approx=True)
        acc = jnp.clip(acc, 0.0, 1.0)
    o_ref[...] = acc.astype(o_ref.dtype)


def _matmul_bias_act(p, w, b, act, out_dtype):
    """activation(p @ w + b) — M-tiled, lane-dense-N, bf16-MXU Pallas matmul."""
    M, K = p.shape
    N = w.shape[1]

    # Lane-dense output: pad N (and bias) to a multiple of 128.
    n_pad = _round_up(N, LANE)
    # Tile over M; keep W / bias resident as full blocks.
    m_pad = _round_up(M, SUBLANE)
    tm = min(TM_MAX, m_pad)
    m_pad = _round_up(m_pad, tm)

    p_p = p.astype(COMPUTE_DTYPE)
    if m_pad != M:
        p_p = jnp.pad(p_p, ((0, m_pad - M), (0, 0)))
    w_p = w.astype(COMPUTE_DTYPE)
    b_p = b.astype(jnp.float32).reshape(1, N)
    if n_pad != N:
        w_p = jnp.pad(w_p, ((0, 0), (0, n_pad - N)))
        b_p = jnp.pad(b_p, ((0, 0), (0, n_pad - N)))

    out_bytes = jnp.dtype(out_dtype).itemsize
    cost = pl.CostEstimate(
        flops=2 * m_pad * K * n_pad,
        transcendentals=(m_pad * n_pad if act == "sigmoid" else 0),
        bytes_accessed=(p_p.size * 2 + w_p.size * 2 + b_p.size * 4
                        + m_pad * n_pad * out_bytes),
    )
    kern = functools.partial(_matmul_bias_act_kernel, act=act)
    out = pl.pallas_call(
        kern,
        out_shape=jax.ShapeDtypeStruct((m_pad, n_pad), out_dtype),
        grid=(m_pad // tm,),
        in_specs=[
            pl.BlockSpec((tm, K), lambda i: (i, 0)),      # patch tile (pipelined)
            pl.BlockSpec((K, n_pad), lambda i: (0, 0)),   # weights (resident)
            pl.BlockSpec((1, n_pad), lambda i: (0, 0)),   # bias    (resident)
        ],
        out_specs=pl.BlockSpec((tm, n_pad), lambda i: (i, 0)),
        compiler_params=pltpu.CompilerParams(
            dimension_semantics=("parallel",),
            vmem_limit_bytes=32 * 1024 * 1024,
        ),
        cost_estimate=cost,
    )(p_p, w_p, b_p)
    return out[:M, :N]


# ----------------------------------------------------------------------------
# Glue: im2col + layer wrappers (plain JAX pads / reshapes only)
# ----------------------------------------------------------------------------
def _im2col(x_nhwc, k, stride, pad):
    n, h, w, c = x_nhwc.shape
    xp = jnp.pad(x_nhwc, ((0, 0), (pad, pad), (pad, pad), (0, 0)))
    ho = (h + 2 * pad - k) // stride + 1
    wo = (w + 2 * pad - k) // stride + 1
    cols = []
    for kh in range(k):
        for kw in range(k):
            cols.append(
                xp[:, kh:kh + stride * ho:stride, kw:kw + stride * wo:stride, :]
            )
    p = jnp.stack(cols, axis=3)                        # (n, ho, wo, k*k, c)
    return p.reshape(n * ho * wo, k * k * c), (n, ho, wo)


def conv2d(x_nhwc, w_oihw, b, stride, pad, act, out_dtype=COMPUTE_DTYPE):
    cout, cin, k, _ = w_oihw.shape
    p, (n, ho, wo) = _im2col(x_nhwc.astype(COMPUTE_DTYPE), k, stride, pad)
    wm = jnp.transpose(w_oihw, (2, 3, 1, 0)).reshape(k * k * cin, cout)
    y = _matmul_bias_act(p, wm, b, act, out_dtype)
    return y.reshape(n, ho, wo, cout)


def _convT_phase_weight(w_iohw):
    """Combined weight (4*Cin, 4*Cout) for the 4 output-pixel parities of
    ConvTranspose2d(k=3, stride=2, padding=1).  Output pixel (2i+py, 2j+px)
    only reads input pixels {i,i+1} x {j,j+1} (tap = 2*dy + dx)."""
    cin, cout, k, _ = w_iohw.shape
    wc = jnp.zeros((4 * cin, 4 * cout), w_iohw.dtype)
    for py in (0, 1):
        for px in (0, 1):
            ph = 2 * py + px
            for ky in ((1,) if py == 0 else (0, 2)):
                dy = (py + 1 - ky) // 2
                for kx in ((1,) if px == 0 else (0, 2)):
                    dx = (px + 1 - kx) // 2
                    tap = 2 * dy + dx
                    wc = wc.at[tap * cin:(tap + 1) * cin,
                               ph * cout:(ph + 1) * cout].set(w_iohw[:, :, ky, kx])
    return wc


def conv_transpose2d(x_nhwc, w_iohw, b, act, out_dtype=COMPUTE_DTYPE):
    """ConvTranspose2d(k=3, stride=2, padding=1, output_padding=1), exactly
    equivalent to PyTorch, via phase decomposition + depth-to-space
    (no zero-dilated input, no 4x-inflated patch matrix)."""
    cin, cout, k, _ = w_iohw.shape
    n, h, w, _ = x_nhwc.shape
    # one zero row/col at the bottom-right covers the i+1 == H boundary
    xp = jnp.pad(x_nhwc.astype(COMPUTE_DTYPE), ((0, 0), (0, 1), (0, 1), (0, 0)))
    p, _ = _im2col(xp, 2, 1, 0)                        # (n*h*w, 4*cin)
    wc = _convT_phase_weight(w_iohw)                   # (4*cin, 4*cout)
    bc = jnp.tile(b, 4)
    y = _matmul_bias_act(p, wc, bc, act, out_dtype)    # (n*h*w, 4*cout)
    y = y.reshape(n, h, w, 2, 2, cout)                 # (..., py, px, cout)
    y = jnp.transpose(y, (0, 1, 3, 2, 4, 5)).reshape(n, 2 * h, 2 * w, cout)
    return y


# ----------------------------------------------------------------------------
# Parameters (deterministic Kaiming-normal init, biases zero — matches the
# module's init.kaiming_normal_(nonlinearity='leaky_relu') / zero bias)
# ----------------------------------------------------------------------------
def _kaiming_normal(key, shape, fan_in):
    gain = 2.0 ** 0.5  # calculate_gain('leaky_relu', a=0)
    std = gain / (fan_in ** 0.5)
    return std * jax.random.normal(key, shape, jnp.float32)


def init_cae_params(key, img_channels=3):
    k = 3
    keys = jax.random.split(key, 6)
    params = {
        # encoder Conv2d weights: (Cout, Cin, k, k); fan_in = Cin*k*k
        "w1": _kaiming_normal(keys[0], (16, img_channels, k, k), img_channels * k * k),
        "b1": jnp.zeros((16,), jnp.float32),
        "w2": _kaiming_normal(keys[1], (32, 16, k, k), 16 * k * k),
        "b2": jnp.zeros((32,), jnp.float32),
        "w3": _kaiming_normal(keys[2], (64, 32, k, k), 32 * k * k),
        "b3": jnp.zeros((64,), jnp.float32),
        # decoder ConvTranspose2d weights: (Cin, Cout, k, k); PyTorch fan_in = Cout*k*k
        "w4": _kaiming_normal(keys[3], (64, 32, k, k), 32 * k * k),
        "b4": jnp.zeros((32,), jnp.float32),
        "w5": _kaiming_normal(keys[4], (32, 16, k, k), 16 * k * k),
        "b5": jnp.zeros((16,), jnp.float32),
        "w6": _kaiming_normal(keys[5], (16, img_channels, k, k), img_channels * k * k),
        "b6": jnp.zeros((img_channels,), jnp.float32),
    }
    return params


# ----------------------------------------------------------------------------
# Full CAE forward (NCHW in -> NCHW out, like the PyTorch module)
# ----------------------------------------------------------------------------
@jax.jit
def cae_forward(x_nchw, params):
    x = jnp.transpose(x_nchw, (0, 2, 3, 1))  # NCHW -> NHWC
    # encoder (intermediate activations kept in bf16)
    x = conv2d(x, params["w1"], params["b1"], 2, 1, "leaky_relu")
    x = conv2d(x, params["w2"], params["b2"], 2, 1, "leaky_relu")
    x = conv2d(x, params["w3"], params["b3"], 2, 1, "leaky_relu")
    # decoder
    x = conv_transpose2d(x, params["w4"], params["b4"], "leaky_relu")
    x = conv_transpose2d(x, params["w5"], params["b5"], "leaky_relu")
    x = conv_transpose2d(x, params["w6"], params["b6"], "sigmoid",
                         out_dtype=jnp.float32)
    return jnp.transpose(x, (0, 3, 1, 2))    # NHWC -> NCHW


if __name__ == "__main__":
    key = jax.random.PRNGKey(0)
    k_param, k_x = jax.random.split(key)
    img_channels = 3
    x = jax.random.uniform(k_x, (2, img_channels, 16, 16), jnp.float32)

    params = init_cae_params(k_param, img_channels)
    y = cae_forward(x, params)
    y = jax.block_until_ready(y)

    assert y.shape == x.shape, f"shape mismatch: {y.shape} vs {x.shape}"
    assert bool(jnp.all(jnp.isfinite(y)))
    assert bool(jnp.all((y >= 0.0) & (y <= 1.0)))  # sigmoid output range
    print("KERNEL_OK")
</pallas_src>

<mosaic_0001>
module attributes {stable_mosaic.version = 11 : i64} {
  func.func @_matmul_bias_act_kernel(%arg0: i32, %arg1: memref<128x27xbf16, #tpu.memory_space<vmem>>, %arg2: memref<27x128xbf16, #tpu.memory_space<vmem>>, %arg3: memref<1x128xf32, #tpu.memory_space<vmem>>, %arg4: memref<128x128xbf16, #tpu.memory_space<vmem>>) attributes {dimension_semantics = [#tpu.dimension_semantics<parallel>], iteration_bounds = array<i64: 1>, scalar_prefetch = 0 : i64, scratch_operands = 0 : i64, tpu.core_type = #tpu.core_type<tc>, window_params = [{transform_indices = @transform_0, window_bounds = array<i64: 128, 27>}, {pipeline_mode = #tpu.pipeline_mode<synchronous>, transform_indices = @transform_1, window_bounds = array<i64: 27, 128>}, {pipeline_mode = #tpu.pipeline_mode<synchronous>, transform_indices = @transform_2, window_bounds = array<i64: 1, 128>}, {transform_indices = @transform_3, window_bounds = array<i64: 128, 128>}]} {
    %c0 = arith.constant 0 : index
    %c0_0 = arith.constant 0 : index
    %0 = vector.load %arg1[%c0, %c0_0] : memref<128x27xbf16, #tpu.memory_space<vmem>>, vector<128x27xbf16>
    %c0_1 = arith.constant 0 : index
    %c0_2 = arith.constant 0 : index
    %1 = vector.load %arg2[%c0_1, %c0_2] : memref<27x128xbf16, #tpu.memory_space<vmem>>, vector<27x128xbf16>
    %cst = arith.constant dense<0.000000e+00> : vector<128x128xf32>
    %2 = tpu.matmul %0, %1, %cst {dimension_numbers = #tpu.dot_dimension_numbers<[1], [0], [0], [1], [0, 0, 1, 1], [], []>} : vector<128x27xbf16>, vector<27x128xbf16>, vector<128x128xf32> -> vector<128x128xf32>
    %c0_3 = arith.constant 0 : index
    %c0_4 = arith.constant 0 : index
    %3 = vector.load %arg3[%c0_3, %c0_4] : memref<1x128xf32, #tpu.memory_space<vmem>>, vector<1x128xf32>
    %4 = vector.broadcast %3 : vector<1x128xf32> to vector<128x128xf32>
    %5 = arith.addf %2, %4 : vector<128x128xf32>
    %cst_5 = arith.constant 0.000000e+00 : f32
    %6 = vector.broadcast %cst_5 : f32 to vector<128x128xf32>
    %7 = arith.cmpf oge, %5, %6 : vector<128x128xf32>
    %cst_6 = arith.constant 0.00999999977 : f32
    %8 = vector.broadcast %cst_6 : f32 to vector<128x128xf32>
    %9 = arith.mulf %8, %5 : vector<128x128xf32>
    %10 = arith.select %7, %5, %9 : vector<128x128xi1>, vector<128x128xf32>
    %11 = arith.truncf %10 : vector<128x128xf32> to vector<128x128xbf16>
    %c0_7 = arith.constant 0 : index
    %c0_8 = arith.constant 0 : index
    %12 = vector.load %arg4[%c0_7, %c0_8] : memref<128x128xbf16, #tpu.memory_space<vmem>>, vector<128x128xbf16>
    tpu.vector_store %arg4[%c0_7, %c0_8], %11 {strides = array<i32>} : memref<128x128xbf16, #tpu.memory_space<vmem>>, vector<128x128xbf16>,
    return
  }
  func.func @transform_0(%arg0: i32) -> (i32, i32) {
    %c0_i32 = arith.constant 0 : i32
    %c0_i32_0 = arith.constant 0 : i32
    return %arg0, %c0_i32 : i32, i32
  }
  func.func @transform_1(%arg0: i32) -> (i32, i32) {
    %c0_i32 = arith.constant 0 : i32
    %c0_i32_0 = arith.constant 0 : i32
    %c0_i32_1 = arith.constant 0 : i32
    return %c0_i32, %c0_i32_0 : i32, i32
  }
  func.func @transform_2(%arg0: i32) -> (i32, i32) {
    %c0_i32 = arith.constant 0 : i32
    %c0_i32_0 = arith.constant 0 : i32
    %c0_i32_1 = arith.constant 0 : i32
    return %c0_i32, %c0_i32_0 : i32, i32
  }
  func.func @transform_3(%arg0: i32) -> (i32, i32) {
    %c0_i32 = arith.constant 0 : i32
    %c0_i32_0 = arith.constant 0 : i32
    return %arg0, %c0_i32 : i32, i32
  }
}

module attributes {stable_mosaic.version = 11 : i64} {
  func.func @_matmul_bias_act_kernel(%arg0: i32, %arg1: memref<32x144xbf16, #tpu.memory_space<vmem>>, %arg2: memref<144x128xbf16, #tpu.memory_space<vmem>>, %arg3: memref<1x128xf32, #tpu.memory_space<vmem>>, %arg4: memref<32x128xbf16, #tpu.memory_space<vmem>>) attributes {dimension_semantics = [#tpu.dimension_semantics<parallel>], iteration_bounds = array<i64: 1>, scalar_prefetch = 0 : i64, scratch_operands = 0 : i64, tpu.core_type = #tpu.core_type<tc>, window_params = [{transform_indices = @transform_0, window_bounds = array<i64: 32, 144>}, {pipeline_mode = #tpu.pipeline_mode<synchronous>, transform_indices = @transform_1, window_bounds = array<i64: 144, 128>}, {pipeline_mode = #tpu.pipeline_mode<synchronous>, transform_indices = @transform_2, window_bounds = array<i64: 1, 128>}, {transform_indices = @transform_3, window_bounds = array<i64: 32, 128>}]} {
    %c0 = arith.constant 0 : index
    %c0_0 = arith.constant 0 : index
    %0 = vector.load %arg1[%c0, %c0_0] : memref<32x144xbf16, #tpu.memory_space<vmem>>, vector<32x144xbf16>
    %c0_1 = arith.constant 0 : index
    %c0_2 = arith.constant 0 : index
    %1 = vector.load %arg2[%c0_1, %c0_2] : memref<144x128xbf16, #tpu.memory_space<vmem>>, vector<144x128xbf16>
    %cst = arith.constant dense<0.000000e+00> : vector<32x128xf32>
    %2 = tpu.matmul %0, %1, %cst {dimension_numbers = #tpu.dot_dimension_numbers<[1], [0], [0], [1], [0, 0, 1, 1], [], []>} : vector<32x144xbf16>, vector<144x128xbf16>, vector<32x128xf32> -> vector<32x128xf32>
    %c0_3 = arith.constant 0 : index
    %c0_4 = arith.constant 0 : index
    %3 = vector.load %arg3[%c0_3, %c0_4] : memref<1x128xf32, #tpu.memory_space<vmem>>, vector<1x128xf32>
    %4 = vector.broadcast %3 : vector<1x128xf32> to vector<32x128xf32>
    %5 = arith.addf %2, %4 : vector<32x128xf32>
    %cst_5 = arith.constant 0.000000e+00 : f32
    %6 = vector.broadcast %cst_5 : f32 to vector<32x128xf32>
    %7 = arith.cmpf oge, %5, %6 : vector<32x128xf32>
    %cst_6 = arith.constant 0.00999999977 : f32
    %8 = vector.broadcast %cst_6 : f32 to vector<32x128xf32>
    %9 = arith.mulf %8, %5 : vector<32x128xf32>
    %10 = arith.select %7, %5, %9 : vector<32x128xi1>, vector<32x128xf32>
    %11 = arith.truncf %10 : vector<32x128xf32> to vector<32x128xbf16>
    %c0_7 = arith.constant 0 : index
    %c0_8 = arith.constant 0 : index
    %12 = vector.load %arg4[%c0_7, %c0_8] : memref<32x128xbf16, #tpu.memory_space<vmem>>, vector<32x128xbf16>
    tpu.vector_store %arg4[%c0_7, %c0_8], %11 {strides = array<i32>} : memref<32x128xbf16, #tpu.memory_space<vmem>>, vector<32x128xbf16>,
    return
  }
  func.func @transform_0(%arg0: i32) -> (i32, i32) {
    %c0_i32 = arith.constant 0 : i32
    %c0_i32_0 = arith.constant 0 : i32
    return %arg0, %c0_i32 : i32, i32
  }
  func.func @transform_1(%arg0: i32) -> (i32, i32) {
    %c0_i32 = arith.constant 0 : i32
    %c0_i32_0 = arith.constant 0 : i32
    %c0_i32_1 = arith.constant 0 : i32
    return %c0_i32, %c0_i32_0 : i32, i32
  }
  func.func @transform_2(%arg0: i32) -> (i32, i32) {
    %c0_i32 = arith.constant 0 : i32
    %c0_i32_0 = arith.constant 0 : i32
    %c0_i32_1 = arith.constant 0 : i32
    return %c0_i32, %c0_i32_0 : i32, i32
  }
  func.func @transform_3(%arg0: i32) -> (i32, i32) {
    %c0_i32 = arith.constant 0 : i32
    %c0_i32_0 = arith.constant 0 : i32
    return %arg0, %c0_i32 : i32, i32
  }
}

module attributes {stable_mosaic.version = 11 : i64} {
  func.func @_matmul_bias_act_kernel(%arg0: i32, %arg1: memref<8x288xbf16, #tpu.memory_space<vmem>>, %arg2: memref<288x128xbf16, #tpu.memory_space<vmem>>, %arg3: memref<1x128xf32, #tpu.memory_space<vmem>>, %arg4: memref<8x128xbf16, #tpu.memory_space<vmem>>) attributes {dimension_semantics = [#tpu.dimension_semantics<parallel>], iteration_bounds = array<i64: 1>, scalar_prefetch = 0 : i64, scratch_operands = 0 : i64, tpu.core_type = #tpu.core_type<tc>, window_params = [{transform_indices = @transform_0, window_bounds = array<i64: 8, 288>}, {pipeline_mode = #tpu.pipeline_mode<synchronous>, transform_indices = @transform_1, window_bounds = array<i64: 288, 128>}, {pipeline_mode = #tpu.pipeline_mode<synchronous>, transform_indices = @transform_2, window_bounds = array<i64: 1, 128>}, {transform_indices = @transform_3, window_bounds = array<i64: 8, 128>}]} {
    %c0 = arith.constant 0 : index
    %c0_0 = arith.constant 0 : index
    %0 = vector.load %arg1[%c0, %c0_0] : memref<8x288xbf16, #tpu.memory_space<vmem>>, vector<8x288xbf16>
    %c0_1 = arith.constant 0 : index
    %c0_2 = arith.constant 0 : index
    %1 = vector.load %arg2[%c0_1, %c0_2] : memref<288x128xbf16, #tpu.memory_space<vmem>>, vector<288x128xbf16>
    %cst = arith.constant dense<0.000000e+00> : vector<8x128xf32>
    %2 = tpu.matmul %0, %1, %cst {dimension_numbers = #tpu.dot_dimension_numbers<[1], [0], [0], [1], [0, 0, 1, 1], [], []>} : vector<8x288xbf16>, vector<288x128xbf16>, vector<8x128xf32> -> vector<8x128xf32>
    %c0_3 = arith.constant 0 : index
    %c0_4 = arith.constant 0 : index
    %3 = vector.load %arg3[%c0_3, %c0_4] : memref<1x128xf32, #tpu.memory_space<vmem>>, vector<1x128xf32>
    %4 = vector.broadcast %3 : vector<1x128xf32> to vector<8x128xf32>
    %5 = arith.addf %2, %4 : vector<8x128xf32>
    %cst_5 = arith.constant 0.000000e+00 : f32
    %6 = vector.broadcast %cst_5 : f32 to vector<8x128xf32>
    %7 = arith.cmpf oge, %5, %6 : vector<8x128xf32>
    %cst_6 = arith.constant 0.00999999977 : f32
    %8 = vector.broadcast %cst_6 : f32 to vector<8x128xf32>
    %9 = arith.mulf %8, %5 : vector<8x128xf32>
    %10 = arith.select %7, %5, %9 : vector<8x128xi1>, vector<8x128xf32>
    %11 = arith.truncf %10 : vector<8x128xf32> to vector<8x128xbf16>
    %c0_7 = arith.constant 0 : index
    %c0_8 = arith.constant 0 : index
    %12 = vector.load %arg4[%c0_7, %c0_8] : memref<8x128xbf16, #tpu.memory_space<vmem>>, vector<8x128xbf16>
    tpu.vector_store %arg4[%c0_7, %c0_8], %11 {strides = array<i32>} : memref<8x128xbf16, #tpu.memory_space<vmem>>, vector<8x128xbf16>,
    return
  }
  func.func @transform_0(%arg0: i32) -> (i32, i32) {
    %c0_i32 = arith.constant 0 : i32
    %c0_i32_0 = arith.constant 0 : i32
    return %arg0, %c0_i32 : i32, i32
  }
  func.func @transform_1(%arg0: i32) -> (i32, i32) {
    %c0_i32 = arith.constant 0 : i32
    %c0_i32_0 = arith.constant 0 : i32
    %c0_i32_1 = arith.constant 0 : i32
    return %c0_i32, %c0_i32_0 : i32, i32
  }
  func.func @transform_2(%arg0: i32) -> (i32, i32) {
    %c0_i32 = arith.constant 0 : i32
    %c0_i32_0 = arith.constant 0 : i32
    %c0_i32_1 = arith.constant 0 : i32
    return %c0_i32, %c0_i32_0 : i32, i32
  }
  func.func @transform_3(%arg0: i32) -> (i32, i32) {
    %c0_i32 = arith.constant 0 : i32
    %c0_i32_0 = arith.constant 0 : i32
    return %arg0, %c0_i32 : i32, i32
  }
}

module attributes {stable_mosaic.version = 11 : i64} {
  func.func @_matmul_bias_act_kernel(%arg0: i32, %arg1: memref<8x256xbf16, #tpu.memory_space<vmem>>, %arg2: memref<256x128xbf16, #tpu.memory_space<vmem>>, %arg3: memref<1x128xf32, #tpu.memory_space<vmem>>, %arg4: memref<8x128xbf16, #tpu.memory_space<vmem>>) attributes {dimension_semantics = [#tpu.dimension_semantics<parallel>], iteration_bounds = array<i64: 1>, scalar_prefetch = 0 : i64, scratch_operands = 0 : i64, tpu.core_type = #tpu.core_type<tc>, window_params = [{transform_indices = @transform_0, window_bounds = array<i64: 8, 256>}, {pipeline_mode = #tpu.pipeline_mode<synchronous>, transform_indices = @transform_1, window_bounds = array<i64: 256, 128>}, {pipeline_mode = #tpu.pipeline_mode<synchronous>, transform_indices = @transform_2, window_bounds = array<i64: 1, 128>}, {transform_indices = @transform_3, window_bounds = array<i64: 8, 128>}]} {
    %c0 = arith.constant 0 : index
    %c0_0 = arith.constant 0 : index
    %0 = vector.load %arg1[%c0, %c0_0] : memref<8x256xbf16, #tpu.memory_space<vmem>>, vector<8x256xbf16>
    %c0_1 = arith.constant 0 : index
    %c0_2 = arith.constant 0 : index
    %1 = vector.load %arg2[%c0_1, %c0_2] : memref<256x128xbf16, #tpu.memory_space<vmem>>, vector<256x128xbf16>
    %cst = arith.constant dense<0.000000e+00> : vector<8x128xf32>
    %2 = tpu.matmul %0, %1, %cst {dimension_numbers = #tpu.dot_dimension_numbers<[1], [0], [0], [1], [0, 0, 1, 1], [], []>} : vector<8x256xbf16>, vector<256x128xbf16>, vector<8x128xf32> -> vector<8x128xf32>
    %c0_3 = arith.constant 0 : index
    %c0_4 = arith.constant 0 : index
    %3 = vector.load %arg3[%c0_3, %c0_4] : memref<1x128xf32, #tpu.memory_space<vmem>>, vector<1x128xf32>
    %4 = vector.broadcast %3 : vector<1x128xf32> to vector<8x128xf32>
    %5 = arith.addf %2, %4 : vector<8x128xf32>
    %cst_5 = arith.constant 0.000000e+00 : f32
    %6 = vector.broadcast %cst_5 : f32 to vector<8x128xf32>
    %7 = arith.cmpf oge, %5, %6 : vector<8x128xf32>
    %cst_6 = arith.constant 0.00999999977 : f32
    %8 = vector.broadcast %cst_6 : f32 to vector<8x128xf32>
    %9 = arith.mulf %8, %5 : vector<8x128xf32>
    %10 = arith.select %7, %5, %9 : vector<8x128xi1>, vector<8x128xf32>
    %11 = arith.truncf %10 : vector<8x128xf32> to vector<8x128xbf16>
    %c0_7 = arith.constant 0 : index
    %c0_8 = arith.constant 0 : index
    %12 = vector.load %arg4[%c0_7, %c0_8] : memref<8x128xbf16, #tpu.memory_space<vmem>>, vector<8x128xbf16>
    tpu.vector_store %arg4[%c0_7, %c0_8], %11 {strides = array<i32>} : memref<8x128xbf16, #tpu.memory_space<vmem>>, vector<8x128xbf16>,
    return
  }
  func.func @transform_0(%arg0: i32) -> (i32, i32) {
    %c0_i32 = arith.constant 0 : i32
    %c0_i32_0 = arith.constant 0 : i32
    return %arg0, %c0_i32 : i32, i32
  }
  func.func @transform_1(%arg0: i32) -> (i32, i32) {
    %c0_i32 = arith.constant 0 : i32
    %c0_i32_0 = arith.constant 0 : i32
    %c0_i32_1 = arith.constant 0 : i32
    return %c0_i32, %c0_i32_0 : i32, i32
  }
  func.func @transform_2(%arg0: i32) -> (i32, i32) {
    %c0_i32 = arith.constant 0 : i32
    %c0_i32_0 = arith.constant 0 : i32
    %c0_i32_1 = arith.constant 0 : i32
    return %c0_i32, %c0_i32_0 : i32, i32
  }
  func.func @transform_3(%arg0: i32) -> (i32, i32) {
    %c0_i32 = arith.constant 0 : i32
    %c0_i32_0 = arith.constant 0 : i32
    return %arg0, %c0_i32 : i32, i32
  }
}

module attributes {stable_mosaic.version = 11 : i64} {
  func.func @_matmul_bias_act_kernel(%arg0: i32, %arg1: memref<32x128xbf16, #tpu.memory_space<vmem>>, %arg2: memref<128x128xbf16, #tpu.memory_space<vmem>>, %arg3: memref<1x128xf32, #tpu.memory_space<vmem>>, %arg4: memref<32x128xbf16, #tpu.memory_space<vmem>>) attributes {dimension_semantics = [#tpu.dimension_semantics<parallel>], iteration_bounds = array<i64: 1>, scalar_prefetch = 0 : i64, scratch_operands = 0 : i64, tpu.core_type = #tpu.core_type<tc>, window_params = [{transform_indices = @transform_0, window_bounds = array<i64: 32, 128>}, {pipeline_mode = #tpu.pipeline_mode<synchronous>, transform_indices = @transform_1, window_bounds = array<i64: 128, 128>}, {pipeline_mode = #tpu.pipeline_mode<synchronous>, transform_indices = @transform_2, window_bounds = array<i64: 1, 128>}, {transform_indices = @transform_3, window_bounds = array<i64: 32, 128>}]} {
    %c0 = arith.constant 0 : index
    %c0_0 = arith.constant 0 : index
    %0 = vector.load %arg1[%c0, %c0_0] : memref<32x128xbf16, #tpu.memory_space<vmem>>, vector<32x128xbf16>
    %c0_1 = arith.constant 0 : index
    %c0_2 = arith.constant 0 : index
    %1 = vector.load %arg2[%c0_1, %c0_2] : memref<128x128xbf16, #tpu.memory_space<vmem>>, vector<128x128xbf16>
    %cst = arith.constant dense<0.000000e+00> : vector<32x128xf32>
    %2 = tpu.matmul %0, %1, %cst {dimension_numbers = #tpu.dot_dimension_numbers<[1], [0], [0], [1], [0, 0, 1, 1], [], []>} : vector<32x128xbf16>, vector<128x128xbf16>, vector<32x128xf32> -> vector<32x128xf32>
    %c0_3 = arith.constant 0 : index
    %c0_4 = arith.constant 0 : index
    %3 = vector.load %arg3[%c0_3, %c0_4] : memref<1x128xf32, #tpu.memory_space<vmem>>, vector<1x128xf32>
    %4 = vector.broadcast %3 : vector<1x128xf32> to vector<32x128xf32>
    %5 = arith.addf %2, %4 : vector<32x128xf32>
    %cst_5 = arith.constant 0.000000e+00 : f32
    %6 = vector.broadcast %cst_5 : f32 to vector<32x128xf32>
    %7 = arith.cmpf oge, %5, %6 : vector<32x128xf32>
    %cst_6 = arith.constant 0.00999999977 : f32
    %8 = vector.broadcast %cst_6 : f32 to vector<32x128xf32>
    %9 = arith.mulf %8, %5 : vector<32x128xf32>
    %10 = arith.select %7, %5, %9 : vector<32x128xi1>, vector<32x128xf32>
    %11 = arith.truncf %10 : vector<32x128xf32> to vector<32x128xbf16>
    %c0_7 = arith.constant 0 : index
    %c0_8 = arith.constant 0 : index
    %12 = vector.load %arg4[%c0_7, %c0_8] : memref<32x128xbf16, #tpu.memory_space<vmem>>, vector<32x128xbf16>
    tpu.vector_store %arg4[%c0_7, %c0_8], %11 {strides = array<i32>} : memref<32x128xbf16, #tpu.memory_space<vmem>>, vector<32x128xbf16>,
    return
  }
  func.func @transform_0(%arg0: i32) -> (i32, i32) {
    %c0_i32 = arith.constant 0 : i32
    %c0_i32_0 = arith.constant 0 : i32
    return %arg0, %c0_i32 : i32, i32
  }
  func.func @transform_1(%arg0: i32) -> (i32, i32) {
    %c0_i32 = arith.constant 0 : i32
    %c0_i32_0 = arith.constant 0 : i32
    %c0_i32_1 = arith.constant 0 : i32
    return %c0_i32, %c0_i32_0 : i32, i32
  }
  func.func @transform_2(%arg0: i32) -> (i32, i32) {
    %c0_i32 = arith.constant 0 : i32
    %c0_i32_0 = arith.constant 0 : i32
    %c0_i32_1 = arith.constant 0 : i32
    return %c0_i32, %c0_i32_0 : i32, i32
  }
  func.func @transform_3(%arg0: i32) -> (i32, i32) {
    %c0_i32 = arith.constant 0 : i32
    %c0_i32_0 = arith.constant 0 : i32
    return %arg0, %c0_i32 : i32, i32
  }
}

module attributes {stable_mosaic.version = 11 : i64} {
  func.func @_matmul_bias_act_kernel(%arg0: i32, %arg1: memref<128x64xbf16, #tpu.memory_space<vmem>>, %arg2: memref<64x128xbf16, #tpu.memory_space<vmem>>, %arg3: memref<1x128xf32, #tpu.memory_space<vmem>>, %arg4: memref<128x128xf32, #tpu.memory_space<vmem>>) attributes {dimension_semantics = [#tpu.dimension_semantics<parallel>], iteration_bounds = array<i64: 1>, scalar_prefetch = 0 : i64, scratch_operands = 0 : i64, tpu.core_type = #tpu.core_type<tc>, window_params = [{transform_indices = @transform_0, window_bounds = array<i64: 128, 64>}, {pipeline_mode = #tpu.pipeline_mode<synchronous>, transform_indices = @transform_1, window_bounds = array<i64: 64, 128>}, {pipeline_mode = #tpu.pipeline_mode<synchronous>, transform_indices = @transform_2, window_bounds = array<i64: 1, 128>}, {transform_indices = @transform_3, window_bounds = array<i64: 128, 128>}]} {
    %c0 = arith.constant 0 : index
    %c0_0 = arith.constant 0 : index
    %0 = vector.load %arg1[%c0, %c0_0] : memref<128x64xbf16, #tpu.memory_space<vmem>>, vector<128x64xbf16>
    %c0_1 = arith.constant 0 : index
    %c0_2 = arith.constant 0 : index
    %1 = vector.load %arg2[%c0_1, %c0_2] : memref<64x128xbf16, #tpu.memory_space<vmem>>, vector<64x128xbf16>
    %cst = arith.constant dense<0.000000e+00> : vector<128x128xf32>
    %2 = tpu.matmul %0, %1, %cst {dimension_numbers = #tpu.dot_dimension_numbers<[1], [0], [0], [1], [0, 0, 1, 1], [], []>} : vector<128x64xbf16>, vector<64x128xbf16>, vector<128x128xf32> -> vector<128x128xf32>
    %c0_3 = arith.constant 0 : index
    %c0_4 = arith.constant 0 : index
    %3 = vector.load %arg3[%c0_3, %c0_4] : memref<1x128xf32, #tpu.memory_space<vmem>>, vector<1x128xf32>
    %4 = vector.broadcast %3 : vector<1x128xf32> to vector<128x128xf32>
    %5 = arith.addf %2, %4 : vector<128x128xf32>
    %cst_5 = arith.constant 0.000000e+00 : f32
    %6 = vector.broadcast %cst_5 : f32 to vector<128x128xf32>
    %7 = arith.subf %6, %5 : vector<128x128xf32>
    %8 = math.exp %7 : vector<128x128xf32>
    %cst_6 = arith.constant 1.000000e+00 : f32
    %9 = vector.broadcast %cst_6 : f32 to vector<128x128xf32>
    %10 = arith.addf %9, %8 : vector<128x128xf32>
    %11 = tpu.reciprocal %10 {approx = true} : vector<128x128xf32> -> vector<128x128xf32>
    %cst_7 = arith.constant 0.000000e+00 : f32
    %cst_8 = arith.constant 1.000000e+00 : f32
    %12 = vector.broadcast %cst_7 : f32 to vector<128x128xf32>
    %13 = arith.maximumf %12, %11 : vector<128x128xf32>
    %14 = vector.broadcast %cst_8 : f32 to vector<128x128xf32>
    %15 = arith.minimumf %14, %13 : vector<128x128xf32>
    %c0_9 = arith.constant 0 : index
    %c0_10 = arith.constant 0 : index
    %16 = vector.load %arg4[%c0_9, %c0_10] : memref<128x128xf32, #tpu.memory_space<vmem>>, vector<128x128xf32>
    tpu.vector_store %arg4[%c0_9, %c0_10], %15 {strides = array<i32>} : memref<128x128xf32, #tpu.memory_space<vmem>>, vector<128x128xf32>,
    return
  }
  func.func @transform_0(%arg0: i32) -> (i32, i32) {
    %c0_i32 = arith.constant 0 : i32
    %c0_i32_0 = arith.constant 0 : i32
    return %arg0, %c0_i32 : i32, i32
  }
  func.func @transform_1(%arg0: i32) -> (i32, i32) {
    %c0_i32 = arith.constant 0 : i32
    %c0_i32_0 = arith.constant 0 : i32
    %c0_i32_1 = arith.constant 0 : i32
    return %c0_i32, %c0_i32_0 : i32, i32
  }
  func.func @transform_2(%arg0: i32) -> (i32, i32) {
    %c0_i32 = arith.constant 0 : i32
    %c0_i32_0 = arith.constant 0 : i32
    %c0_i32_1 = arith.constant 0 : i32
    return %c0_i32, %c0_i32_0 : i32, i32
  }
  func.func @transform_3(%arg0: i32) -> (i32, i32) {
    %c0_i32 = arith.constant 0 : i32
    %c0_i32_0 = arith.constant 0 : i32
    return %arg0, %c0_i32 : i32, i32
  }
}

</mosaic_0001>

<bundles_post_ra>
// kernel: cae_forward.6
= control target key start
LH: loop header
LB: loop body
LE: loop exit
PB: predicated region body
PF: predicated region fallthrough
CT: control target
= control target key end

     0   :  { %vm118_vm0 = vcmask 1044480   ;;  %vm119_vm1 = vcmask 1045504   ;;  %v497_v1 = vmov 65535   ;;  %vm93_vm2 = vcmask 220160   ;;  %s607_s1 = inlined_call_operand.vmem [shape: bf16[27,128], index: 1, kind: input, shape index: {}]   ;;  %s608_s0 = inlined_call_operand.vmem [shape: bf16[128,27], index: 0, kind: input, shape index: {}]   ;;  %s609_s2 = inlined_call_operand.vmem [shape: f32[1,128], index: 2, kind: input, shape index: {}]   ;;  %s610_s3 = inlined_call_operand.vmem [shape: bf16[128,128], index: 3, kind: output, shape index: {}]  }
   0x1   :  { %v487_v0 = vld [vmem:[%s607_s1 + $0x8] sm:$0x3f]   ;;  %v120_v2 = vsel %vm118_vm0, 4294967295, %v497_v1  ;;  %v489_v4 = vld [vmem:[%s608_s0] sm:$0xff]   ;;  %v493_v10 = vld [vmem:[%s608_s0 + $0x10] sm:$0xff]  }
   0x2   :  { %v121_v3 = vsel %vm119_vm1, %v120_v2, 0  ;;  %v488_v6 = vld [vmem:[%s607_s1] sm:$0xff]   ;;  %466 = vmatprep.mubr.msk.bf16.mxu0 %vm93_vm2, %v489_v4  ;;  %v491_v8 = vld [vmem:[%s608_s0 + $0x8] sm:$0xff]   ;;  %v494_v11 = vld [vmem:[%s608_s0 + $0x30] sm:$0xff]  }
   0x3   :  { %v123_v5 = vand.u32 %v487_v0, %v121_v3  ;;  %v490_v7 = vld [vmem:[%s608_s0 + $0x20] sm:$0xff]   ;;  %v492_v9 = vld [vmem:[%s608_s0 + $0x28] sm:$0xff]   ;;  %v495_v12 = vld [vmem:[%s608_s0 + $0x18] sm:$0xff]  }
   0x4   :  { %474 = vmatprep.mubr.msk.bf16.mxu1 %vm93_vm2, %v490_v7  ;;  %v496_v13 = vld [vmem:[%s608_s0 + $0x38] sm:$0xff]   ;;  %v559_v14 = vld [vmem:[%s609_s2] ss:$0 sm:$0xff] }
   0x5   :  { %462 = vmatprep.subr.bf16.mxu0 %v123_v5  ;;  %482 = vmatprep.subr.bf16.mxu1 %v123_v5 }
   0x6   :  { %463 = vmatpush3.bf16.msra.mxu0 %v123_v5  ;;  %484 = vmatpush3.bf16.msra.mxu1 %v123_v5 }
   0x7   :  { %464 = vmatprep.subr.bf16.mxu0 %v488_v6  ;;  %483 = vmatprep.subr.bf16.mxu1 %v488_v6 }
   0xa   :  { %465 = vmatpush3.bf16.msra.mxu0 %v488_v6  ;;  %485 = vmatpush3.bf16.msra.mxu1 %v488_v6 }
   0xd   :  { %467 = vmatmul.mubr.msk.bf16.vlgmr.msra.gmra.mxu0 %vm93_vm2, %v491_v8  ;;  %475 = vmatmul.mubr.msk.bf16.vlgmr.msra.gmra.mxu1 %vm93_vm2, %v492_v9 }
   0xe   :  { %470 = vmatprep.mubr.msk.bf16.mxu0 %vm93_vm2, %v493_v10  ;;  %478 = vmatprep.mubr.msk.bf16.mxu1 %vm93_vm2, %v494_v11 }
  0x15   :  { %471 = vmatmul.mubr.msk.bf16.gmra.mxu0 %vm93_vm2, %v495_v12  ;;  %479 = vmatmul.mubr.msk.bf16.gmra.mxu1 %vm93_vm2, %v496_v13 }
  0xcd   :  { %v468_v15 = vpop.f32.mrf.mxu0  ;;  %v476_v16 = vpop.f32.mrf.mxu1 }
  0xce   :  { %v168_v17 = vadd.f32 %v468_v15, %v559_v14  ;;  %v200_v18 = vadd.f32 %v476_v16, %v559_v14 }
  0xcf   :  { %v159_v19 = vpop.f32.mrf.mxu0  ;;  %v191_v20 = vpop.f32.mrf.mxu1 }
  0xd0   :  { %vm224_vm3 = vcmp.ge.f32.partialorder %v168_v17, 0.0  ;;  %v240_v21 = vmul.f32 0.01, %v168_v17  ;;  %vm232_vm4 = vcmp.ge.f32.partialorder %v200_v18, 0.0  ;;  %v248_v22 = vmul.f32 0.01, %v200_v18 }
  0xd1   :  { %v160_v23 = vadd.f32 %v559_v14, %v159_v19  ;;  %v192_v24 = vadd.f32 %v559_v14, %v191_v20  ;;  %v469_v25 = vpop.f32.mrf.mxu0  ;;  %v477_v26 = vpop.f32.mrf.mxu1 }
  0xd2   :  { %v171_v27 = vadd.f32 %v469_v25, %v559_v14  ;;  %v203_v28 = vadd.f32 %v477_v26, %v559_v14  ;;  %v256_v29 = vsel %vm224_vm3, %v168_v17, %v240_v21  ;;  %v264_v30 = vsel %vm232_vm4, %v200_v18, %v248_v22 }
  0xd3   :  { %vm222_vm5 = vcmp.ge.f32.partialorder %v160_v23, 0.0  ;;  %v238_v31 = vmul.f32 0.01, %v160_v23  ;;  %v162_v32 = vpop.f32.mrf.mxu0  ;;  %v194_v33 = vpop.f32.mrf.mxu1  ;;  %vm230_vm8 = vcmp.ge.f32.partialorder %v192_v24, 0.0  ;;  %v246_v36 = vmul.f32 0.01, %v192_v24 }
  0xd4   :  { %vm225_vm6 = vcmp.ge.f32.partialorder %v171_v27, 0.0  ;;  %v241_v34 = vmul.f32 0.01, %v171_v27  ;;  %vm233_vm7 = vcmp.ge.f32.partialorder %v203_v28, 0.0  ;;  %v249_v35 = vmul.f32 0.01, %v203_v28 }
  0xd5   :  { %v163_v37 = vadd.f32 %v559_v14, %v162_v32  ;;  %v195_v38 = vadd.f32 %v559_v14, %v194_v33  ;;  %v472_v39 = vpop.f32.mrf.mxu0  ;;  %v480_v40 = vpop.f32.mrf.mxu1  ;;  %v254_v51 = vsel %vm222_vm5, %v160_v23, %v238_v31  ;;  %v262_v56 = vsel %vm230_vm8, %v192_v24, %v246_v36 }
  0xd6   :  { %v257_v41 = vsel %vm225_vm6, %v171_v27, %v241_v34  ;;  %v265_v42 = vsel %vm233_vm7, %v203_v28, %v249_v35  ;;  %v184_v43 = vadd.f32 %v472_v39, %v559_v14  ;;  %v216_v44 = vadd.f32 %v480_v40, %v559_v14 }
  0xd7   :  { %v413_v45 = vpack.c.bf16 %v257_v41, %v256_v29  ;;  %v433_v46 = vpack.c.bf16 %v265_v42, %v264_v30  ;;  %vm223_vm9 = vcmp.ge.f32.partialorder %v163_v37, 0.0  ;;  %v239_v47 = vmul.f32 0.01, %v163_v37  ;;  %v175_v48 = vpop.f32.mrf.mxu0  ;;  %v207_v49 = vpop.f32.mrf.mxu1 }
  0xd8   :  { %vm231_vm10 = vcmp.ge.f32.partialorder %v195_v38, 0.0  ;;  %v247_v50 = vmul.f32 0.01, %v195_v38  ;;  %v176_v53 = vadd.f32 %v559_v14, %v175_v48  ;;  %v208_v59 = vadd.f32 %v559_v14, %v207_v49 }
  0xd9   :  { %445 = vst [vmem:[%s610_s3 + $0x8] sm:$0xff] %v413_v45   ;;  %449 = vst [vmem:[%s610_s3 + $0x28] sm:$0xff] %v433_v46   ;;  %v255_v52 = vsel %vm223_vm9, %v163_v37, %v239_v47  ;;  %v473_v54 = vpop.f32.mrf.mxu0  ;;  %v481_v55 = vpop.f32.mrf.mxu1  ;;  %vm228_vm11 = vcmp.ge.f32.partialorder %v184_v43, 0.0  ;;  %v244_v61 = vmul.f32 0.01, %v184_v43  ;;  %vm236_vm12 = vcmp.ge.f32.partialorder %v216_v44, 0.0 }
  0xda   :  { %v408_v57 = vpack.c.bf16 %v255_v52, %v254_v51  ;;  %v263_v58 = vsel %vm231_vm10, %v195_v38, %v247_v50  ;;  %v252_v0 = vmul.f32 0.01, %v216_v44  ;;  %vm226_vm13 = vcmp.ge.f32.partialorder %v176_v53, 0.0 }
  0xdb   :  { %v428_v60 = vpack.c.bf16 %v263_v58, %v262_v56  ;;  %v178_v62 = vpop.f32.mrf.mxu0  ;;  %v210_v63 = vpop.f32.mrf.mxu1  ;;  %v187_v1 = vadd.f32 %v473_v54, %v559_v14  ;;  %v219_v2 = vadd.f32 %v481_v55, %v559_v14  ;;  %v242_v3 = vmul.f32 0.01, %v176_v53 }
  0xdc   :  { %409 = vst [vmem:[%s610_s3] sm:$0xff] %v408_v57   ;;  %vm234_vm14 = vcmp.ge.f32.partialorder %v208_v59, 0.0  ;;  %v179_v4 = vadd.f32 %v559_v14, %v178_v62  ;;  %v211_v5 = vadd.f32 %v559_v14, %v210_v63  ;;  %v250_v6 = vmul.f32 0.01, %v208_v59 }
  0xdd   :  { %448 = vst [vmem:[%s610_s3 + $0x20] sm:$0xff] %v428_v60   ;;  %vm229_vm15 = vcmp.ge.f32.partialorder %v187_v1, 0.0  ;;  %v245_v7 = vmul.f32 0.01, %v187_v1  ;;  %vm237_vm0 = vcmp.ge.f32.partialorder %v219_v2, 0.0  ;;  %v260_v10 = vsel %vm228_vm11, %v184_v43, %v244_v61 }
  0xde   :  { %v253_v8 = vmul.f32 0.01, %v219_v2  ;;  %vm227_vm1 = vcmp.ge.f32.partialorder %v179_v4, 0.0  ;;  %v243_v9 = vmul.f32 0.01, %v179_v4  ;;  %vm235_vm2 = vcmp.ge.f32.partialorder %v211_v5, 0.0 }
  0xdf   :  { %v268_v11 = vsel %vm236_vm12, %v216_v44, %v252_v0  ;;  %v261_v12 = vsel %vm229_vm15, %v187_v1, %v245_v7  ;;  %v251_v13 = vmul.f32 0.01, %v211_v5  ;;  %v258_v15 = vsel %vm226_vm13, %v176_v53, %v242_v3 }
  0xe0   :  { %v423_v16 = vpack.c.bf16 %v261_v12, %v260_v10  ;;  %v269_v17 = vsel %vm237_vm0, %v219_v2, %v253_v8  ;;  %v259_v18 = vsel %vm227_vm1, %v179_v4, %v243_v9  ;;  %v266_v14 = vsel %vm234_vm14, %v208_v59, %v250_v6 }
  0xe1   :  { %v443_v19 = vpack.c.bf16 %v269_v17, %v268_v11  ;;  %v418_v20 = vpack.c.bf16 %v259_v18, %v258_v15  ;;  %v267_v21 = vsel %vm235_vm2, %v211_v5, %v251_v13 }
  0xe2   :  { %447 = vst [vmem:[%s610_s3 + $0x18] sm:$0xff] %v423_v16   ;;  %v438_v22 = vpack.c.bf16 %v267_v21, %v266_v14 }
  0xe3   :  { %451 = vst [vmem:[%s610_s3 + $0x38] sm:$0xff] %v443_v19   ;;  %446 = vst [vmem:[%s610_s3 + $0x10] sm:$0xff] %v418_v20  }
  0xe4   :  { %450 = vst [vmem:[%s610_s3 + $0x30] sm:$0xff] %v438_v22  }

// kernel: cae_forward.7
= control target key start
LH: loop header
LB: loop body
LE: loop exit
PB: predicated region body
PF: predicated region fallthrough
CT: control target
= control target key end

     0   :  { %v277_v0 = vmov 0   ;;  %vm116_vm0 = vcmask 130048   ;;  %s346_s1 = inlined_call_operand.vmem [shape: bf16[144,128], index: 1, kind: input, shape index: {}]   ;;  %s347_s0 = inlined_call_operand.vmem [shape: bf16[32,144], index: 0, kind: input, shape index: {}]   ;;  %s348_s2 = inlined_call_operand.vmem [shape: f32[1,128], index: 2, kind: input, shape index: {}]   ;;  %s349_s3 = inlined_call_operand.vmem [shape: bf16[32,128], index: 3, kind: output, shape index: {}]  }
   0x1   :  { %123 = vmatprep.subr.bf16.mxu0 %v277_v0  ;;  %243 = vmatprep.subr.bf16.mxu1 %v277_v0  ;;  %v262_v1 = vld [vmem:[%s346_s1 + $0x38] sm:$0xff]   ;;  %v263_v2 = vld [vmem:[%s346_s1 + $0x30] sm:$0xff]   ;;  %v264_v3 = vld [vmem:[%s346_s1 + $0x28] sm:$0xff]  }
   0x2   :  { %124 = vmatpush1.bf16.msra.mxu0 %v262_v1  ;;  %252 = vmatpush1.bf16.msra.mxu1 %v262_v1  ;;  %v265_v4 = vld [vmem:[%s346_s1 + $0x20] sm:$0xff]   ;;  %v276_v6 = vld [vmem:[%s347_s0 + $0x14] ss:$8 sps:$4 sm:$0xff]   ;;  %v268_v9 = vld [vmem:[%s346_s1 + $0x8] sm:$0xff]  }
   0x3   :  { %125 = vmatprep.subr.bf16.mxu0 %v277_v0  ;;  %244 = vmatprep.subr.bf16.mxu1 %v277_v0  ;;  %v273_v5 = vld [vmem:[%s347_s0 + $0x4] ss:$8 sps:$4 sm:$0xff]   ;;  %v266_v7 = vld [vmem:[%s346_s1 + $0x18] sm:$0xff]   ;;  %v267_v8 = vld [vmem:[%s346_s1 + $0x10] sm:$0xff]  }
   0x4   :  { %222 = vmatprep.mubr.msk.bf16.mxu0 %vm116_vm0, %v273_v5  ;;  %223 = vmatprep.mubr.msk.bf16.mxu1 %vm116_vm0, %v276_v6  ;;  %v269_v10 = vld [vmem:[%s346_s1] sm:$0xff]   ;;  %v274_v13 = vld [vmem:[%s347_s0 + $0x10] ss:$8 sps:$4 sm:$0xff]  }
   0x5   :  { %v270_v11 = vld [vmem:[%s346_s1 + $0x40] sm:$0xff]  }
   0x6   :  { %126 = vmatpush1.bf16.msra.mxu0 %v263_v2  ;;  %253 = vmatpush1.bf16.msra.mxu1 %v263_v2  ;;  %v271_v12 = vld [vmem:[%s347_s0] ss:$8 sps:$4 sm:$0xff]  }
   0x7   :  { %127 = vmatprep.subr.bf16.mxu0 %v277_v0  ;;  %245 = vmatprep.subr.bf16.mxu1 %v277_v0  ;;  %v208_v14 = vld [vmem:[%s348_s2] ss:$0 sm:$0xff] }
   0xa   :  { %128 = vmatpush1.bf16.msra.mxu0 %v264_v3  ;;  %254 = vmatpush1.bf16.msra.mxu1 %v264_v3 }
   0xb   :  { %129 = vmatprep.subr.bf16.mxu0 %v277_v0  ;;  %246 = vmatprep.subr.bf16.mxu1 %v277_v0 }
   0xe   :  { %130 = vmatpush1.bf16.msra.mxu0 %v265_v4  ;;  %255 = vmatpush1.bf16.msra.mxu1 %v265_v4 }
   0xf   :  { %131 = vmatprep.subr.bf16.mxu0 %v277_v0  ;;  %247 = vmatprep.subr.bf16.mxu1 %v277_v0 }
  0x12   :  { %132 = vmatpush1.bf16.msra.mxu0 %v266_v7  ;;  %256 = vmatpush1.bf16.msra.mxu1 %v266_v7 }
  0x13   :  { %133 = vmatprep.subr.bf16.mxu0 %v277_v0  ;;  %248 = vmatprep.subr.bf16.mxu1 %v277_v0 }
  0x16   :  { %134 = vmatpush1.bf16.msra.mxu0 %v267_v8  ;;  %257 = vmatpush1.bf16.msra.mxu1 %v267_v8 }
  0x17   :  { %135 = vmatprep.subr.bf16.mxu0 %v277_v0  ;;  %249 = vmatprep.subr.bf16.mxu1 %v277_v0 }
  0x1a   :  { %136 = vmatpush1.bf16.msra.mxu0 %v268_v9  ;;  %258 = vmatpush1.bf16.msra.mxu1 %v268_v9 }
  0x1b   :  { %137 = vmatprep.subr.bf16.mxu0 %v277_v0  ;;  %250 = vmatprep.subr.bf16.mxu1 %v277_v0 }
  0x1e   :  { %138 = vmatpush1.bf16.msra.mxu0 %v269_v10  ;;  %259 = vmatpush1.bf16.msra.mxu1 %v269_v10 }
  0x1f   :  { %153 = vmatprep.subr.bf16.mxu0 %v277_v0  ;;  %251 = vmatprep.subr.bf16.mxu1 %v277_v0 }
  0x22   :  { %154 = vmatpush2.bf16.msra.mxu0 %v270_v11  ;;  %260 = vmatpush2.bf16.msra.mxu1 %v270_v11 }
  0x25   :  { %156 = vmatmul.mubr.bf16.vlgmr.msra.gmra.mxu0 %v271_v12  ;;  %164 = vmatmul.mubr.bf16.vlgmr.msra.gmra.mxu1 %v274_v13 }
  0xe5   :  { %v157_v15 = vpop.f32.mrf.mxu0  ;;  %v165_v16 = vpop.f32.mrf.mxu1 }
  0xe6   :  { %v158_v17 = vadd.f32 %v208_v14, %v157_v15  ;;  %v166_v18 = vadd.f32 %v208_v14, %v165_v16 }
  0xe7   :  { %v159_v19 = vpop.f32.mrf.mxu0  ;;  %v167_v20 = vpop.f32.mrf.mxu1 }
  0xe8   :  { %v176_v23 = vmul.f32 0.01, %v158_v17  ;;  %v178_v24 = vmul.f32 0.01, %v166_v18  ;;  %vm172_vm1 = vcmp.ge.f32.partialorder %v158_v17, 0.0  ;;  %vm174_vm2 = vcmp.ge.f32.partialorder %v166_v18, 0.0 }
  0xe9   :  { %v160_v21 = vpop.f32.mrf.mxu0  ;;  %v168_v22 = vpop.f32.mrf.mxu1 }
  0xea   :  { %v161_v25 = vadd.f32 %v208_v14, %v160_v21  ;;  %v169_v26 = vadd.f32 %v208_v14, %v168_v22  ;;  %v180_v31 = vsel %vm172_vm1, %v158_v17, %v176_v23  ;;  %v182_v32 = vsel %vm174_vm2, %v166_v18, %v178_v24 }
  0xeb   :  { %v162_v27 = vpop.f32.mrf.mxu0  ;;  %v170_v28 = vpop.f32.mrf.mxu1 }
  0xec   :  { %vm173_vm3 = vcmp.ge.f32.partialorder %v161_v25, 0.0  ;;  %v177_v29 = vmul.f32 0.01, %v161_v25  ;;  %vm175_vm4 = vcmp.ge.f32.partialorder %v169_v26, 0.0  ;;  %v179_v30 = vmul.f32 0.01, %v169_v26 }
  0xee   :  { %v181_v33 = vsel %vm173_vm3, %v161_v25, %v177_v29  ;;  %v183_v34 = vsel %vm175_vm4, %v169_v26, %v179_v30 }
  0xef   :  { %v235_v35 = vpack.c.bf16 %v181_v33, %v180_v31  ;;  %v240_v36 = vpack.c.bf16 %v183_v34, %v182_v32 }
  0xf1   :  { %236 = vst [vmem:[%s349_s3] sm:$0xff] %v235_v35   ;;  %242 = vst [vmem:[%s349_s3 + $0x8] sm:$0xff] %v240_v36  }

// kernel: tile.18
= control target key start
LH: loop header
LB: loop body
LE: loop exit
PB: predicated region body
PF: predicated region fallthrough
CT: control target
= control target key end

     0   :  { %s22_s0 = inlined_call_operand.vmem [shape: f32[32], index: 0, kind: input, shape index: {}]   ;;  %s23_s1 = inlined_call_operand.vmem [shape: f32[4,32], index: 1, kind: output, shape index: {}]  }
   0x1   :  { %v4_v0 = vld [vmem:[%s22_s0] ss:$0 sm:$0xff] }
   0x2   :  { %5 = vst [vmem:[%s23_s1] sm:$0xf] %v4_v0 }

// kernel: tile.19
= control target key start
LH: loop header
LB: loop body
LE: loop exit
PB: predicated region body
PF: predicated region fallthrough
CT: control target
= control target key end

     0   :  { %vm8_vm0 = vcmask 261120   ;;  %s40_s8 = smov 32   ;;  %s41_s9 = smov 64   ;;  %vm14_vm1 = vcmask 1048320   ;;  %vm20_vm2 = vcmask 785920   ;;  %vm26_vm3 = vcmask 523520   ;;  %s58_s0 = inlined_call_operand.vmem [shape: f32[4,32], index: 0, kind: input, shape index: {}]   ;;  %s59_s1 = inlined_call_operand.vmem [shape: f32[1,128], index: 1, kind: output, shape index: {}]  }
   0x1   :  { %v5_v0 = vld [vmem:[%s58_s0] sm:$0xf]  ;;  %s39_s0 = smov 96  }
   0x2   :  { %6 = vst [vmem:[#allocation1] sm:$0xf] %v5_v0 }
   0x9   :  { %v11_v1 = vld [vmem:[#allocation1 + $0x3] sm:$0x1]   ;;  %v23_v2 = vld [vmem:[#allocation1 + $0x1] sm:$0x1]   ;;  %v7_v3 = vld [vmem:[#allocation1] sm:$0x1]  }
   0xa   :  { %12 = vrot.lane.b32.xlu0 %v11_v1, %s39_s0  ;;  %24 = vrot.lane.b32.xlu1 %v23_v2, %s40_s8  ;;  %v17_v4 = vld [vmem:[#allocation1 + $0x2] sm:$0x1]   ;;  %9 = vst.msk [vmem:[#allocation0] sm:$0x1] %vm8_vm0, %v7_v3  }
   0xe   :  { %18 = vrot.lane.b32.xlu0 %v17_v4, %s41_s9 }
  0x7c   :  { %v13_v5 = vpop.permute.xlu0 %12   ;;  %v25_v6 = vpop.permute.xlu1 %24  }
  0x7d   :  { %15 = vst.msk [vmem:[#allocation0] sm:$0x1] %vm14_vm1, %v13_v5  }
  0x80   :  { %v19_v7 = vpop.permute.xlu0 %18  }
  0x81   :  { %21 = vst.msk [vmem:[#allocation0] sm:$0x1] %vm20_vm2, %v19_v7  }
  0x82   :  { %27 = vst.msk [vmem:[#allocation0] sm:$0x1] %vm26_vm3, %v25_v6  }
  0x89   :  { %v32_v8 = vld [vmem:[#allocation0] sm:$0x1] }
  0x8a   :  { %35 = vst [vmem:[%s59_s1] sm:$0x1] %v32_v8 }

// kernel: cae_forward.8
= control target key start
LH: loop header
LB: loop body
LE: loop exit
PB: predicated region body
PF: predicated region fallthrough
CT: control target
= control target key end

     0   :  { %v350_v1 = vmov 0.0   ;;  %vm351_vm0 = vmmov 0   ;;  %vm178_vm1 = vcmask 261120   ;;  %s438_s1 = inlined_call_operand.vmem [shape: bf16[288,128], index: 1, kind: input, shape index: {}]   ;;  %s439_s0 = inlined_call_operand.vmem [shape: bf16[8,288], index: 0, kind: input, shape index: {}]   ;;  %s440_s2 = inlined_call_operand.vmem [shape: f32[1,128], index: 2, kind: input, shape index: {}]   ;;  %s441_s3 = inlined_call_operand.vmem [shape: bf16[8,128], index: 3, kind: output, shape index: {}]  }
   0x1   :  { %v329_v0 = vld [vmem:[%s438_s1 + $0x78] sm:$0xff]   ;;  %319 = vmatprep.subr.bf16.mxu1 %v350_v1  ;;  %323 = vmatprep.mubr.msk.bf16.mxu1 %vm351_vm0, %v350_v1  ;;  %v331_v3 = vld [vmem:[%s438_s1 + $0x70] sm:$0xff]   ;;  %v333_v5 = vld [vmem:[%s438_s1 + $0x68] sm:$0xff]  }
   0x2   :  { %v330_v2 = vld [vmem:[%s438_s1 + $0x38] sm:$0xff]   ;;  %294 = vmatprep.subr.bf16.mxu0 %v329_v0  ;;  %v332_v4 = vld [vmem:[%s438_s1 + $0x30] sm:$0xff]   ;;  %v334_v6 = vld [vmem:[%s438_s1 + $0x28] sm:$0xff]  }
   0x3   :  { %295 = vmatpush3.bf16.msra.mxu0 %v330_v2  ;;  %v335_v7 = vld [vmem:[%s438_s1 + $0x60] sm:$0xff]   ;;  %v337_v9 = vld [vmem:[%s438_s1 + $0x58] sm:$0xff]   ;;  %v343_v10 = vld [vmem:[%s438_s1 + $0x88] sm:$0xff]  }
   0x4   :  { %296 = vmatprep.subr.bf16.mxu0 %v331_v3  ;;  %v336_v8 = vld [vmem:[%s438_s1 + $0x20] sm:$0xff]   ;;  %v338_v11 = vld [vmem:[%s438_s1 + $0x18] sm:$0xff]   ;;  %v339_v12 = vld [vmem:[%s438_s1 + $0x50] sm:$0xff]   ;;  %320 = vmatpush3.bf16.msra.mxu1 %v343_v10 }
   0x5   :  { %321 = vmatprep.subr.bf16.mxu1 %v350_v1  ;;  %v346_v13 = vld [vmem:[%s438_s1 + $0x80] sm:$0xff]   ;;  %v340_v15 = vld [vmem:[%s438_s1 + $0x10] sm:$0xff]   ;;  %v349_v17 = vld [vmem:[%s439_s0 + $0x8] ss:$0 sps:$4 sm:$0xff]  }
   0x6   :  { %v15_v14 = vld [vmem:[%s439_s0] sm:$0xff]  ;;  %v341_v18 = vld [vmem:[%s438_s1 + $0x48] sm:$0xff]  }
   0x7   :  { %297 = vmatpush3.bf16.msra.mxu0 %v332_v4  ;;  %v273_v16 = vcombine.high %v15_v14, %v15_v14  ;;  %v342_v19 = vld [vmem:[%s438_s1 + $0x8] sm:$0xff]   ;;  %v344_v20 = vld [vmem:[%s438_s1 + $0x40] sm:$0xff]   ;;  %v272_v22 = vcombine.low %v15_v14, %v15_v14 }
   0x8   :  { %298 = vmatprep.subr.bf16.mxu0 %v333_v5  ;;  %322 = vmatpush3.bf16.msra.mxu1 %v346_v13  ;;  %v345_v21 = vld [vmem:[%s438_s1] sm:$0xff]  }
   0x9   :  { %214 = vmatprep.mubr.bf16.mxu0 %v273_v16  ;;  %v271_v28 = vld [vmem:[%s440_s2] ss:$0 sm:$0xff] }
   0xb   :  { %299 = vmatpush3.bf16.msra.mxu0 %v334_v6  ;;  %324 = vmatmul.mubr.msk.bf16.vlgmr.msra.gmra.mxu1 %vm178_vm1, %v349_v17 }
   0xc   :  { %300 = vmatprep.subr.bf16.mxu0 %v335_v7 }
   0xf   :  { %301 = vmatpush3.bf16.msra.mxu0 %v336_v8 }
  0x10   :  { %302 = vmatprep.subr.bf16.mxu0 %v337_v9 }
  0x13   :  { %303 = vmatpush3.bf16.msra.mxu0 %v338_v11 }
  0x14   :  { %304 = vmatprep.subr.bf16.mxu0 %v339_v12 }
  0x17   :  { %305 = vmatpush3.bf16.msra.mxu0 %v340_v15 }
  0x18   :  { %306 = vmatprep.subr.bf16.mxu0 %v341_v18 }
  0x1b   :  { %307 = vmatpush3.bf16.msra.mxu0 %v342_v19 }
  0x1c   :  { %308 = vmatprep.subr.bf16.mxu0 %v344_v20 }
  0x1f   :  { %309 = vmatpush3.bf16.msra.mxu0 %v345_v21 }
  0x22   :  { %215 = vmatmul.mubr.bf16.vlgmr.msra.gmra.mxu0 %v272_v22 }
  0xcb   :  { %v256_v23 = vpop.f32.mrf.mxu1 }
  0xcd   :  { %v325_v24 = vpop.f32.mrf.mxu1 }
  0xcf   :  { %v259_v25 = vpop.f32.mrf.mxu1 }
  0xd1   :  { %v326_v26 = vpop.f32.mrf.mxu1 }
  0xe2   :  { %v310_v27 = vpop.f32.mrf.mxu0 }
  0xe4   :  { %v311_v29 = vpop.f32.mrf.mxu0 }
  0xe5   :  { %v312_v30 = vadd.f32 %v311_v29, %v310_v27 }
  0xe6   :  { %v313_v31 = vpop.f32.mrf.mxu0 }
  0xe7   :  { %v217_v32 = vadd.f32 %v312_v30, %v271_v28 }
  0xe8   :  { %v314_v33 = vpop.f32.mrf.mxu0 }
  0xe9   :  { %v257_v34 = vadd.f32 %v256_v23, %v217_v32 }
  0xeb   :  { %vm262_vm2 = vcmp.ge.f32.partialorder %v257_v34, 0.0  ;;  %v263_v35 = vmul.f32 0.01, %v257_v34 }
  0xed   :  { %v264_v36 = vsel %vm262_vm2, %v257_v34, %v263_v35 }
  0xee   :  { %v265_v37 = vpack.c.bf16 %v264_v36, %v264_v36 }
  0xf0   :  { %266 = vst [vmem:[%s441_s3] sm:$0xf] %v265_v37 }

// kernel: cae_forward.9
= control target key start
LH: loop header
LB: loop body
LE: loop exit
PB: predicated region body
PF: predicated region fallthrough
CT: control target
= control target key end

     0   :  { %s343_s1 = inlined_call_operand.vmem [shape: bf16[256,128], index: 1, kind: input, shape index: {}]   ;;  %s344_s0 = inlined_call_operand.vmem [shape: bf16[8,256], index: 0, kind: input, shape index: {}]   ;;  %s345_s2 = inlined_call_operand.vmem [shape: f32[1,128], index: 2, kind: input, shape index: {}]   ;;  %s346_s3 = inlined_call_operand.vmem [shape: bf16[8,128], index: 3, kind: output, shape index: {}]  }
   0x1   :  { %v248_v0 = vld [vmem:[%s343_s1 + $0x78] sm:$0xff]   ;;  %v250_v2 = vld [vmem:[%s343_s1 + $0x70] sm:$0xff]   ;;  %v252_v4 = vld [vmem:[%s343_s1 + $0x68] sm:$0xff]  }
   0x2   :  { %v249_v1 = vld [vmem:[%s343_s1 + $0x38] sm:$0xff]   ;;  %226 = vmatprep.subr.bf16.mxu0 %v248_v0  ;;  %v251_v3 = vld [vmem:[%s343_s1 + $0x30] sm:$0xff]   ;;  %v253_v5 = vld [vmem:[%s343_s1 + $0x28] sm:$0xff]  }
   0x3   :  { %227 = vmatpush3.bf16.msra.mxu0 %v249_v1  ;;  %v254_v6 = vld [vmem:[%s343_s1 + $0x60] sm:$0xff]   ;;  %v256_v8 = vld [vmem:[%s343_s1 + $0x58] sm:$0xff]   ;;  %v258_v10 = vld [vmem:[%s343_s1 + $0x50] sm:$0xff]  }
   0x4   :  { %228 = vmatprep.subr.bf16.mxu0 %v250_v2  ;;  %v255_v7 = vld [vmem:[%s343_s1 + $0x20] sm:$0xff]   ;;  %v257_v9 = vld [vmem:[%s343_s1 + $0x18] sm:$0xff]   ;;  %v259_v13 = vld [vmem:[%s343_s1 + $0x10] sm:$0xff]  }
   0x5   :  { %v15_v11 = vld [vmem:[%s344_s0] sm:$0xff]  ;;  %v260_v14 = vld [vmem:[%s343_s1 + $0x48] sm:$0xff]  }
   0x6   :  { %v209_v12 = vcombine.high %v15_v11, %v15_v11  ;;  %v261_v15 = vld [vmem:[%s343_s1 + $0x8] sm:$0xff]   ;;  %v262_v16 = vld [vmem:[%s343_s1 + $0x40] sm:$0xff]   ;;  %v208_v18 = vcombine.low %v15_v11, %v15_v11 }
   0x7   :  { %229 = vmatpush3.bf16.msra.mxu0 %v251_v3  ;;  %v263_v17 = vld [vmem:[%s343_s1] sm:$0xff]  }
   0x8   :  { %230 = vmatprep.subr.bf16.mxu0 %v252_v4  ;;  %190 = vmatprep.mubr.bf16.mxu0 %v209_v12  ;;  %v207_v20 = vld [vmem:[%s345_s2] ss:$0 sm:$0xff] }
   0xb   :  { %231 = vmatpush3.bf16.msra.mxu0 %v253_v5 }
   0xc   :  { %232 = vmatprep.subr.bf16.mxu0 %v254_v6 }
   0xf   :  { %233 = vmatpush3.bf16.msra.mxu0 %v255_v7 }
  0x10   :  { %234 = vmatprep.subr.bf16.mxu0 %v256_v8 }
  0x13   :  { %235 = vmatpush3.bf16.msra.mxu0 %v257_v9 }
  0x14   :  { %236 = vmatprep.subr.bf16.mxu0 %v258_v10 }
  0x17   :  { %237 = vmatpush3.bf16.msra.mxu0 %v259_v13 }
  0x18   :  { %238 = vmatprep.subr.bf16.mxu0 %v260_v14 }
  0x1b   :  { %239 = vmatpush3.bf16.msra.mxu0 %v261_v15 }
  0x1c   :  { %240 = vmatprep.subr.bf16.mxu0 %v262_v16 }
  0x1f   :  { %241 = vmatpush3.bf16.msra.mxu0 %v263_v17 }
  0x22   :  { %191 = vmatmul.mubr.bf16.vlgmr.msra.gmra.mxu0 %v208_v18 }
  0xe2   :  { %v242_v19 = vpop.f32.mrf.mxu0 }
  0xe4   :  { %v243_v21 = vpop.f32.mrf.mxu0 }
  0xe5   :  { %v244_v22 = vadd.f32 %v243_v21, %v242_v19 }
  0xe6   :  { %v245_v23 = vpop.f32.mrf.mxu0 }
  0xe7   :  { %v193_v24 = vadd.f32 %v244_v22, %v207_v20 }
  0xe8   :  { %v246_v25 = vpop.f32.mrf.mxu0 }
  0xe9   :  { %vm198_vm0 = vcmp.ge.f32.partialorder %v193_v24, 0.0  ;;  %v199_v26 = vmul.f32 0.01, %v193_v24 }
  0xeb   :  { %v200_v27 = vsel %vm198_vm0, %v193_v24, %v199_v26 }
  0xec   :  { %v201_v28 = vpack.c.bf16 %v200_v27, %v200_v27 }
  0xee   :  { %202 = vst [vmem:[%s346_s3] sm:$0xf] %v201_v28 }

// kernel: tile.23
= control target key start
LH: loop header
LB: loop body
LE: loop exit
PB: predicated region body
PF: predicated region fallthrough
CT: control target
= control target key end

     0   :  { %s22_s0 = inlined_call_operand.vmem [shape: f32[16], index: 0, kind: input, shape index: {}]   ;;  %s23_s1 = inlined_call_operand.vmem [shape: f32[4,16], index: 1, kind: output, shape index: {}]  }
   0x1   :  { %v4_v0 = vld [vmem:[%s22_s0] ss:$0 sm:$0xff] }
   0x2   :  { %5 = vst [vmem:[%s23_s1] sm:$0xf] %v4_v0 }

// kernel: tile.24
= control target key start
LH: loop header
LB: loop body
LE: loop exit
PB: predicated region body
PF: predicated region fallthrough
CT: control target
= control target key end

     0   :  { %vm8_vm0 = vcmask 130048   ;;  %s40_s8 = smov 16   ;;  %s41_s9 = smov 32   ;;  %vm14_vm1 = vcmask 523648   ;;  %vm20_vm2 = vcmask 392448   ;;  %vm26_vm3 = vcmask 261248   ;;  %s58_s0 = inlined_call_operand.vmem [shape: f32[4,16], index: 0, kind: input, shape index: {}]   ;;  %s59_s1 = inlined_call_operand.vmem [shape: f32[1,64], index: 1, kind: output, shape index: {}]  }
   0x1   :  { %v5_v0 = vld [vmem:[%s58_s0] sm:$0xf]  ;;  %s39_s0 = smov 48  }
   0x2   :  { %6 = vst [vmem:[#allocation1] sm:$0xf] %v5_v0 }
   0x9   :  { %v11_v1 = vld [vmem:[#allocation1 + $0x3] sm:$0x1]   ;;  %v23_v2 = vld [vmem:[#allocation1 + $0x1] sm:$0x1]   ;;  %v7_v3 = vld [vmem:[#allocation1] sm:$0x1]  }
   0xa   :  { %12 = vrot.lane.b32.xlu0 %v11_v1, %s39_s0  ;;  %24 = vrot.lane.b32.xlu1 %v23_v2, %s40_s8  ;;  %v17_v4 = vld [vmem:[#allocation1 + $0x2] sm:$0x1]   ;;  %9 = vst.msk [vmem:[#allocation0] sm:$0x1] %vm8_vm0, %v7_v3  }
   0xe   :  { %18 = vrot.lane.b32.xlu0 %v17_v4, %s41_s9 }
  0x7c   :  { %v13_v5 = vpop.permute.xlu0 %12   ;;  %v25_v6 = vpop.permute.xlu1 %24  }
  0x7d   :  { %15 = vst.msk [vmem:[#allocation0] sm:$0x1] %vm14_vm1, %v13_v5  }
  0x80   :  { %v19_v7 = vpop.permute.xlu0 %18  }
  0x81   :  { %21 = vst.msk [vmem:[#allocation0] sm:$0x1] %vm20_vm2, %v19_v7  }
  0x82   :  { %27 = vst.msk [vmem:[#allocation0] sm:$0x1] %vm26_vm3, %v25_v6  }
  0x89   :  { %v32_v8 = vld [vmem:[#allocation0] sm:$0x1] }
  0x8a   :  { %35 = vst [vmem:[%s59_s1] sm:$0x1] %v32_v8 }

// kernel: cae_forward.10
= control target key start
LH: loop header
LB: loop body
LE: loop exit
PB: predicated region body
PF: predicated region fallthrough
CT: control target
= control target key end

     0   :  { %s316_s1 = inlined_call_operand.vmem [shape: bf16[128,128], index: 1, kind: input, shape index: {}]   ;;  %s317_s0 = inlined_call_operand.vmem [shape: bf16[32,128], index: 0, kind: input, shape index: {}]   ;;  %s318_s2 = inlined_call_operand.vmem [shape: f32[1,128], index: 2, kind: input, shape index: {}]   ;;  %s319_s3 = inlined_call_operand.vmem [shape: bf16[32,128], index: 3, kind: output, shape index: {}]  }
   0x1   :  { %v247_v0 = vld [vmem:[%s316_s1 + $0x38] sm:$0xff]   ;;  %v248_v1 = vld [vmem:[%s316_s1 + $0x30] sm:$0xff]   ;;  %v249_v2 = vld [vmem:[%s316_s1 + $0x28] sm:$0xff]  }
   0x2   :  { %227 = vmatprep.subr.bf16.mxu0 %v247_v0  ;;  %v250_v3 = vld [vmem:[%s316_s1 + $0x20] sm:$0xff]   ;;  %v251_v5 = vld [vmem:[%s316_s1 + $0x18] sm:$0xff]   ;;  %v252_v6 = vld [vmem:[%s316_s1 + $0x10] sm:$0xff]  }
   0x3   :  { %228 = vmatpush3.bf16.msra.mxu0 %v247_v0  ;;  %v255_v4 = vld [vmem:[%s317_s0] sm:$0xff]   ;;  %v253_v7 = vld [vmem:[%s316_s1 + $0x8] sm:$0xff]  }
   0x4   :  { %229 = vmatprep.subr.bf16.mxu0 %v248_v1  ;;  %243 = vmatprep.mubr.bf16.mxu0 %v255_v4  ;;  %v254_v8 = vld [vmem:[%s316_s1] sm:$0xff]   ;;  %v256_v9 = vld [vmem:[%s317_s0 + $0x8] sm:$0xff]  }
   0x5   :  { %v187_v10 = vld [vmem:[%s318_s2] ss:$0 sm:$0xff] }
   0x7   :  { %230 = vmatpush3.bf16.msra.mxu0 %v248_v1 }
   0x8   :  { %231 = vmatprep.subr.bf16.mxu0 %v249_v2 }
   0xb   :  { %232 = vmatpush3.bf16.msra.mxu0 %v249_v2 }
   0xc   :  { %233 = vmatprep.subr.bf16.mxu0 %v250_v3 }
   0xf   :  { %234 = vmatpush3.bf16.msra.mxu0 %v250_v3 }
  0x10   :  { %235 = vmatprep.subr.bf16.mxu0 %v251_v5 }
  0x13   :  { %236 = vmatpush3.bf16.msra.mxu0 %v251_v5 }
  0x14   :  { %237 = vmatprep.subr.bf16.mxu0 %v252_v6 }
  0x17   :  { %238 = vmatpush3.bf16.msra.mxu0 %v252_v6 }
  0x18   :  { %239 = vmatprep.subr.bf16.mxu0 %v253_v7 }
  0x1b   :  { %240 = vmatpush3.bf16.msra.mxu0 %v253_v7 }
  0x1c   :  { %241 = vmatprep.subr.bf16.mxu0 %v254_v8 }
  0x1f   :  { %242 = vmatpush3.bf16.msra.mxu0 %v254_v8 }
  0x22   :  { %244 = vmatmul.mubr.bf16.vlgmr.msra.gmra.mxu0 %v256_v9 }
  0xe2   :  { %v245_v11 = vpop.f32.mrf.mxu0 }
  0xe3   :  { %v145_v12 = vadd.f32 %v245_v11, %v187_v10 }
  0xe4   :  { %v136_v13 = vpop.f32.mrf.mxu0 }
  0xe5   :  { %v137_v14 = vadd.f32 %v187_v10, %v136_v13  ;;  %v157_v16 = vmul.f32 0.01, %v145_v12  ;;  %vm153_vm0 = vcmp.ge.f32.partialorder %v145_v12, 0.0 }
  0xe6   :  { %v246_v15 = vpop.f32.mrf.mxu0 }
  0xe7   :  { %v148_v17 = vadd.f32 %v246_v15, %v187_v10  ;;  %v155_v19 = vmul.f32 0.01, %v137_v14  ;;  %vm151_vm2 = vcmp.ge.f32.partialorder %v137_v14, 0.0  ;;  %v161_v22 = vsel %vm153_vm0, %v145_v12, %v157_v16 }
  0xe8   :  { %v139_v18 = vpop.f32.mrf.mxu0 }
  0xe9   :  { %vm154_vm1 = vcmp.ge.f32.partialorder %v148_v17, 0.0  ;;  %v158_v20 = vmul.f32 0.01, %v148_v17  ;;  %v140_v21 = vadd.f32 %v187_v10, %v139_v18  ;;  %v159_v26 = vsel %vm151_vm2, %v137_v14, %v155_v19 }
  0xeb   :  { %v162_v23 = vsel %vm154_vm1, %v148_v17, %v158_v20  ;;  %vm152_vm3 = vcmp.ge.f32.partialorder %v140_v21, 0.0  ;;  %v156_v24 = vmul.f32 0.01, %v140_v21 }
  0xec   :  { %v214_v25 = vpack.c.bf16 %v162_v23, %v161_v22 }
  0xed   :  { %v160_v27 = vsel %vm152_vm3, %v140_v21, %v156_v24 }
  0xee   :  { %216 = vst [vmem:[%s319_s3 + $0x8] sm:$0xff] %v214_v25   ;;  %v209_v28 = vpack.c.bf16 %v160_v27, %v159_v26 }
  0xf0   :  { %210 = vst [vmem:[%s319_s3] sm:$0xff] %v209_v28  }

// kernel: tile.28
= control target key start
LH: loop header
LB: loop body
LE: loop exit
PB: predicated region body
PF: predicated region fallthrough
CT: control target
= control target key end

     0   :  { %s22_s0 = inlined_call_operand.vmem [shape: f32[3], index: 0, kind: input, shape index: {}]   ;;  %s23_s1 = inlined_call_operand.vmem [shape: f32[4,3], index: 1, kind: output, shape index: {}]  }
   0x1   :  { %v4_v0 = vld [vmem:[%s22_s0] ss:$0 sm:$0xff] }
   0x2   :  { %5 = vst [vmem:[%s23_s1] sm:$0xf] %v4_v0 }

// kernel: tile.29
= control target key start
LH: loop header
LB: loop body
LE: loop exit
PB: predicated region body
PF: predicated region fallthrough
CT: control target
= control target key end

     0   :  { %vm8_vm0 = vcmask 23552   ;;  %s40_s8 = smov 3   ;;  %s41_s9 = smov 6   ;;  %vm14_vm1 = vcmask 97352   ;;  %vm20_vm2 = vcmask 72752   ;;  %vm26_vm3 = vcmask 48152   ;;  %s58_s0 = inlined_call_operand.vmem [shape: f32[4,3], index: 0, kind: input, shape index: {}]   ;;  %s59_s1 = inlined_call_operand.vmem [shape: f32[1,12], index: 1, kind: output, shape index: {}]  }
   0x1   :  { %v5_v0 = vld [vmem:[%s58_s0] sm:$0xf]  ;;  %s39_s0 = smov 9  }
   0x2   :  { %6 = vst [vmem:[#allocation1] sm:$0xf] %v5_v0 }
   0x9   :  { %v11_v1 = vld [vmem:[#allocation1 + $0x3] sm:$0x1]   ;;  %v23_v2 = vld [vmem:[#allocation1 + $0x1] sm:$0x1]   ;;  %v7_v3 = vld [vmem:[#allocation1] sm:$0x1]  }
   0xa   :  { %12 = vrot.lane.b32.xlu0 %v11_v1, %s39_s0  ;;  %24 = vrot.lane.b32.xlu1 %v23_v2, %s40_s8  ;;  %v17_v4 = vld [vmem:[#allocation1 + $0x2] sm:$0x1]   ;;  %9 = vst.msk [vmem:[#allocation0] sm:$0x1] %vm8_vm0, %v7_v3  }
   0xe   :  { %18 = vrot.lane.b32.xlu0 %v17_v4, %s41_s9 }
  0x7c   :  { %v13_v5 = vpop.permute.xlu0 %12   ;;  %v25_v6 = vpop.permute.xlu1 %24  }
  0x7d   :  { %15 = vst.msk [vmem:[#allocation0] sm:$0x1] %vm14_vm1, %v13_v5  }
  0x80   :  { %v19_v7 = vpop.permute.xlu0 %18  }
  0x81   :  { %21 = vst.msk [vmem:[#allocation0] sm:$0x1] %vm20_vm2, %v19_v7  }
  0x82   :  { %27 = vst.msk [vmem:[#allocation0] sm:$0x1] %vm26_vm3, %v25_v6  }
  0x89   :  { %v32_v8 = vld [vmem:[#allocation0] sm:$0x1] }
  0x8a   :  { %35 = vst [vmem:[%s59_s1] sm:$0x1] %v32_v8 }

// kernel: cae_forward.11
= control target key start
LH: loop header
LB: loop body
LE: loop exit
PB: predicated region body
PF: predicated region fallthrough
CT: control target
= control target key end

     0   :  { %vm110_vm0 = vcmask 523264   ;;  %s638_s1 = inlined_call_operand.vmem [shape: bf16[64,128], index: 1, kind: input, shape index: {}]   ;;  %s639_s0 = inlined_call_operand.vmem [shape: bf16[128,64], index: 0, kind: input, shape index: {}]   ;;  %s640_s2 = inlined_call_operand.vmem [shape: f32[1,128], index: 2, kind: input, shape index: {}]   ;;  %s641_s3 = inlined_call_operand.vmem [shape: f32[128,128], index: 3, kind: output, shape index: {}]  }
   0x1   :  { %v429_v0 = vld [vmem:[%s638_s1 + $0x18] sm:$0xff]   ;;  %v430_v1 = vld [vmem:[%s638_s1 + $0x10] sm:$0xff]   ;;  %v431_v2 = vld [vmem:[%s638_s1 + $0x8] sm:$0xff]  }
   0x2   :  { %397 = vmatprep.subr.bf16.mxu0 %v429_v0  ;;  %421 = vmatprep.subr.bf16.mxu1 %v429_v0  ;;  %v433_v3 = vld [vmem:[%s639_s0] sm:$0xff]   ;;  %v435_v6 = vld [vmem:[%s639_s0 + $0x8] sm:$0xff]   ;;  %v437_v8 = vld [vmem:[%s639_s0 + $0x10] sm:$0xff]  }
   0x3   :  { %398 = vmatpush3.bf16.msra.mxu0 %v429_v0  ;;  %425 = vmatpush3.bf16.msra.mxu1 %v429_v0  ;;  %v434_v4 = vld [vmem:[%s639_s0 + $0x20] sm:$0xff]   ;;  %v436_v7 = vld [vmem:[%s639_s0 + $0x28] sm:$0xff]   ;;  %v438_v9 = vld [vmem:[%s639_s0 + $0x30] sm:$0xff]  }
   0x4   :  { %399 = vmatprep.subr.bf16.mxu0 %v430_v1  ;;  %422 = vmatprep.subr.bf16.mxu1 %v430_v1  ;;  %v432_v5 = vld [vmem:[%s638_s1] sm:$0xff]   ;;  %v439_v10 = vld [vmem:[%s639_s0 + $0x18] sm:$0xff]  }
   0x5   :  { %405 = vmatprep.mubr.msk.bf16.mxu0 %vm110_vm0, %v433_v3  ;;  %413 = vmatprep.mubr.msk.bf16.mxu1 %vm110_vm0, %v434_v4  ;;  %v440_v11 = vld [vmem:[%s639_s0 + $0x38] sm:$0xff]   ;;  %v572_v12 = vld [vmem:[%s640_s2] ss:$0 sm:$0xff] }
   0x7   :  { %400 = vmatpush3.bf16.msra.mxu0 %v430_v1  ;;  %426 = vmatpush3.bf16.msra.mxu1 %v430_v1 }
   0x8   :  { %401 = vmatprep.subr.bf16.mxu0 %v431_v2  ;;  %423 = vmatprep.subr.bf16.mxu1 %v431_v2 }
   0xb   :  { %402 = vmatpush3.bf16.msra.mxu0 %v431_v2  ;;  %427 = vmatpush3.bf16.msra.mxu1 %v431_v2 }
   0xc   :  { %403 = vmatprep.subr.bf16.mxu0 %v432_v5  ;;  %424 = vmatprep.subr.bf16.mxu1 %v432_v5 }
   0xf   :  { %404 = vmatpush3.bf16.msra.mxu0 %v432_v5  ;;  %428 = vmatpush3.bf16.msra.mxu1 %v432_v5 }
  0x12   :  { %406 = vmatmul.mubr.msk.bf16.vlgmr.msra.gmra.mxu0 %vm110_vm0, %v435_v6  ;;  %414 = vmatmul.mubr.msk.bf16.vlgmr.msra.gmra.mxu1 %vm110_vm0, %v436_v7 }
  0x13   :  { %409 = vmatprep.mubr.msk.bf16.mxu0 %vm110_vm0, %v437_v8  ;;  %417 = vmatprep.mubr.msk.bf16.mxu1 %vm110_vm0, %v438_v9 }
  0x1a   :  { %410 = vmatmul.mubr.msk.bf16.gmra.mxu0 %vm110_vm0, %v439_v10  ;;  %418 = vmatmul.mubr.msk.bf16.gmra.mxu1 %vm110_vm0, %v440_v11 }
  0xd2   :  { %v407_v13 = vpop.f32.mrf.mxu0  ;;  %v415_v14 = vpop.f32.mrf.mxu1 }
  0xd3   :  { %v178_v15 = vadd.f32 %v407_v13, %v572_v12  ;;  %v210_v16 = vadd.f32 %v415_v14, %v572_v12 }
  0xd4   :  { %v169_v17 = vpop.f32.mrf.mxu0  ;;  %v201_v18 = vpop.f32.mrf.mxu1 }
  0xd5   :  { %v234_v19 = vsub.f32 0.0, %v178_v15  ;;  %v242_v20 = vsub.f32 0.0, %v210_v16  ;;  %v170_v21 = vadd.f32 %v572_v12, %v169_v17  ;;  %v202_v22 = vadd.f32 %v572_v12, %v201_v18 }
  0xd6   :  { %v408_v23 = vpop.f32.mrf.mxu0  ;;  %v416_v24 = vpop.f32.mrf.mxu1 }
  0xd7   :  { %v252_v25 = vmul.f32 1.442695, %v234_v19  ;;  %v268_v26 = vmul.f32 1.442695, %v242_v20  ;;  %v232_v27 = vsub.f32 0.0, %v170_v21  ;;  %v240_v28 = vsub.f32 0.0, %v202_v22 }
  0xd8   :  { %v181_v29 = vadd.f32 %v408_v23, %v572_v12  ;;  %v213_v30 = vadd.f32 %v416_v24, %v572_v12  ;;  %v172_v31 = vpop.f32.mrf.mxu0  ;;  %v204_v32 = vpop.f32.mrf.mxu1 }
  0xd9   :  { %441 = vpow2.f32 %v252_v25  ;;  %v248_v33 = vmul.f32 1.442695, %v232_v27  ;;  %v264_v34 = vmul.f32 1.442695, %v240_v28  ;;  %v173_v35 = vadd.f32 %v572_v12, %v172_v31 }
  0xda   :  { %443 = vpow2.f32 %v268_v26  ;;  %v235_v36 = vsub.f32 0.0, %v181_v29  ;;  %v243_v37 = vsub.f32 0.0, %v213_v30  ;;  %v205_v38 = vadd.f32 %v572_v12, %v204_v32  ;;  %v411_v39 = vpop.f32.mrf.mxu0  ;;  %v419_v40 = vpop.f32.mrf.mxu1 }
  0xdb   :  { %445 = vpow2.f32 %v248_v33  ;;  %v233_v41 = vsub.f32 0.0, %v173_v35  ;;  %v194_v42 = vadd.f32 %v411_v39, %v572_v12  ;;  %v226_v43 = vadd.f32 %v419_v40, %v572_v12 }
  0xdc   :  { %447 = vpow2.f32 %v264_v34  ;;  %v254_v44 = vmul.f32 1.442695, %v235_v36  ;;  %v270_v45 = vmul.f32 1.442695, %v243_v37  ;;  %v241_v46 = vsub.f32 0.0, %v205_v38  ;;  %v185_v47 = vpop.f32.mrf.mxu0  ;;  %v217_v48 = vpop.f32.mrf.mxu1 }
  0xdd   :  { %v250_v49 = vmul.f32 1.442695, %v233_v41  ;;  %v238_v50 = vsub.f32 0.0, %v194_v42  ;;  %v246_v51 = vsub.f32 0.0, %v226_v43  ;;  %v186_v52 = vadd.f32 %v572_v12, %v185_v47 }
  0xde   :  { %449 = vpow2.f32 %v254_v44  ;;  %v266_v53 = vmul.f32 1.442695, %v241_v46  ;;  %v218_v54 = vadd.f32 %v572_v12, %v217_v48  ;;  %v412_v55 = vpop.f32.mrf.mxu0  ;;  %v420_v56 = vpop.f32.mrf.mxu1 }
  0xdf   :  { %451 = vpow2.f32 %v270_v45  ;;  %v260_v57 = vmul.f32 1.442695, %v238_v50  ;;  %v276_v58 = vmul.f32 1.442695, %v246_v51  ;;  %v236_v59 = vsub.f32 0.0, %v186_v52 }
  0xe0   :  { %453 = vpow2.f32 %v250_v49  ;;  %v244_v60 = vsub.f32 0.0, %v218_v54  ;;  %v197_v61 = vadd.f32 %v412_v55, %v572_v12  ;;  %v229_v62 = vadd.f32 %v420_v56, %v572_v12  ;;  %v188_v63 = vpop.f32.mrf.mxu0  ;;  %v220_v0 = vpop.f32.mrf.mxu1 }
  0xe1   :  { %455 = vpow2.f32 %v266_v53  ;;  %v256_v1 = vmul.f32 1.442695, %v236_v59  ;;  %v189_v2 = vadd.f32 %v572_v12, %v188_v63  ;;  %v221_v3 = vadd.f32 %v572_v12, %v220_v0 }
  0xe2   :  { %457 = vpow2.f32 %v260_v57  ;;  %v272_v4 = vmul.f32 1.442695, %v244_v60  ;;  %v239_v5 = vsub.f32 0.0, %v197_v61  ;;  %v247_v6 = vsub.f32 0.0, %v229_v62 }
  0xe3   :  { %459 = vpow2.f32 %v276_v58  ;;  %v237_v7 = vsub.f32 0.0, %v189_v2  ;;  %v245_v11 = vsub.f32 0.0, %v221_v3 }
  0xe4   :  { %461 = vpow2.f32 %v256_v1  ;;  %v262_v8 = vmul.f32 1.442695, %v239_v5  ;;  %v278_v9 = vmul.f32 1.442695, %v247_v6 }
  0xe5   :  { %463 = vpow2.f32 %v272_v4  ;;  %v258_v10 = vmul.f32 1.442695, %v237_v7  ;;  %v274_v19 = vmul.f32 1.442695, %v245_v11 }
  0xe6   :  { %v442_v13 = vpop.eup %441  ;;  %465 = vpow2.f32 %v262_v8 }
  0xe7   :  { %v444_v14 = vpop.eup %443  ;;  %v282_v15 = vadd.f32 1.0, %v442_v13  ;;  %467 = vpow2.f32 %v278_v9 }
  0xe8   :  { %v446_v16 = vpop.eup %445  ;;  %v290_v17 = vadd.f32 1.0, %v444_v14  ;;  %469 = vpow2.f32 %v258_v10 }
  0xe9   :  { %v448_v12 = vpop.eup %447  ;;  %471 = vrcp.f32 %v282_v15  ;;  %v280_v18 = vadd.f32 1.0, %v446_v16 }
  0xea   :  { %473 = vrcp.f32 %v290_v17  ;;  %v288_v20 = vadd.f32 1.0, %v448_v12 }
  0xeb   :  { %v450_v21 = vpop.eup %449  ;;  %475 = vrcp.f32 %v280_v18 }
  0xec   :  { %v452_v22 = vpop.eup %451  ;;  %477 = vrcp.f32 %v288_v20  ;;  %v283_v23 = vadd.f32 1.0, %v450_v21 }
  0xed   :  { %v454_v24 = vpop.eup %453  ;;  %v291_v25 = vadd.f32 1.0, %v452_v22  ;;  %479 = vpow2.f32 %v274_v19 }
  0xee   :  { %v456_v26 = vpop.eup %455  ;;  %481 = vrcp.f32 %v283_v23  ;;  %v281_v27 = vadd.f32 1.0, %v454_v24 }
  0xef   :  { %v458_v28 = vpop.eup %457  ;;  %483 = vrcp.f32 %v291_v25  ;;  %v289_v29 = vadd.f32 1.0, %v456_v26 }
  0xf0   :  { %v460_v30 = vpop.eup %459  ;;  %485 = vrcp.f32 %v281_v27  ;;  %v286_v31 = vadd.f32 1.0, %v458_v28 }
  0xf1   :  { %v462_v32 = vpop.eup %461  ;;  %487 = vrcp.f32 %v289_v29  ;;  %v294_v33 = vadd.f32 1.0, %v460_v30 }
  0xf2   :  { %v464_v34 = vpop.eup %463  ;;  %489 = vrcp.f32 %v286_v31  ;;  %v284_v35 = vadd.f32 1.0, %v462_v32 }
  0xf3   :  { %v466_v36 = vpop.eup %465  ;;  %491 = vrcp.f32 %v294_v33  ;;  %v292_v37 = vadd.f32 1.0, %v464_v34 }
  0xf4   :  { %v468_v38 = vpop.eup %467  ;;  %493 = vrcp.f32 %v284_v35  ;;  %v287_v39 = vadd.f32 1.0, %v466_v36 }
  0xf5   :  { %v470_v40 = vpop.eup %469  ;;  %495 = vrcp.f32 %v292_v37  ;;  %v295_v41 = vadd.f32 1.0, %v468_v38 }
  0xf6   :  { %v472_v42 = vpop.eup %471  ;;  %497 = vrcp.f32 %v287_v39  ;;  %v285_v43 = vadd.f32 1.0, %v470_v40 }
  0xf7   :  { %v474_v44 = vpop.eup %473  ;;  %v314_v45 = vmax.f32 %v472_v42, 0.0  ;;  %499 = vrcp.f32 %v295_v41 }
  0xf8   :  { %v476_v46 = vpop.eup %475  ;;  %v322_v47 = vmax.f32 %v474_v44, 0.0  ;;  %501 = vrcp.f32 %v285_v43 }
  0xf9   :  { %v478_v48 = vpop.eup %477  ;;  %v330_v49 = vmin.f32 %v314_v45, 1.0  ;;  %v312_v50 = vmax.f32 %v476_v46, 0.0 }
  0xfa   :  { %v480_v51 = vpop.eup %479  ;;  %v338_v52 = vmin.f32 %v322_v47, 1.0  ;;  %v320_v53 = vmax.f32 %v478_v48, 0.0 }
  0xfb   :  { %v482_v54 = vpop.eup %481  ;;  %346 = vst [vmem:[%s641_s3 + $0x10] sm:$0xff] %v330_v49  ;;  %v328_v55 = vmin.f32 %v312_v50, 1.0  ;;  %v293_v56 = vadd.f32 1.0, %v480_v51 }
  0xfc   :  { %v484_v57 = vpop.eup %483  ;;  %354 = vst [vmem:[%s641_s3 + $0x50] sm:$0xff] %v338_v52  ;;  %v336_v58 = vmin.f32 %v320_v53, 1.0  ;;  %v315_v59 = vmax.f32 %v482_v54, 0.0 }
  0xfd   :  { %v486_v60 = vpop.eup %485  ;;  %344 = vst [vmem:[%s641_s3] sm:$0xff] %v328_v55  ;;  %v323_v61 = vmax.f32 %v484_v57, 0.0  ;;  %503 = vrcp.f32 %v293_v56 }
  0xfe   :  { %v488_v62 = vpop.eup %487  ;;  %352 = vst [vmem:[%s641_s3 + $0x40] sm:$0xff] %v336_v58  ;;  %v331_v63 = vmin.f32 %v315_v59, 1.0  ;;  %v313_v0 = vmax.f32 %v486_v60, 0.0 }
  0xff   :  { %v490_v1 = vpop.eup %489  ;;  %v339_v2 = vmin.f32 %v323_v61, 1.0  ;;  %v321_v3 = vmax.f32 %v488_v62, 0.0 }
 0x100   :  { %v492_v4 = vpop.eup %491  ;;  %347 = vst [vmem:[%s641_s3 + $0x18] sm:$0xff] %v331_v63  ;;  %v329_v5 = vmin.f32 %v313_v0, 1.0  ;;  %v318_v6 = vmax.f32 %v490_v1, 0.0 }
 0x101   :  { %v494_v7 = vpop.eup %493  ;;  %355 = vst [vmem:[%s641_s3 + $0x58] sm:$0xff] %v339_v2  ;;  %v337_v8 = vmin.f32 %v321_v3, 1.0  ;;  %v326_v9 = vmax.f32 %v492_v4, 0.0 }
 0x102   :  { %v496_v10 = vpop.eup %495  ;;  %345 = vst [vmem:[%s641_s3 + $0x8] sm:$0xff] %v329_v5  ;;  %v334_v11 = vmin.f32 %v318_v6, 1.0  ;;  %v316_v13 = vmax.f32 %v494_v7, 0.0 }
 0x103   :  { %v498_v14 = vpop.eup %497  ;;  %353 = vst [vmem:[%s641_s3 + $0x48] sm:$0xff] %v337_v8  ;;  %v342_v15 = vmin.f32 %v326_v9, 1.0  ;;  %v324_v16 = vmax.f32 %v496_v10, 0.0 }
 0x104   :  { %v500_v17 = vpop.eup %499  ;;  %350 = vst [vmem:[%s641_s3 + $0x30] sm:$0xff] %v334_v11  ;;  %v332_v12 = vmin.f32 %v316_v13, 1.0  ;;  %v319_v18 = vmax.f32 %v498_v14, 0.0 }
 0x105   :  { %v502_v19 = vpop.eup %501  ;;  %358 = vst [vmem:[%s641_s3 + $0x70] sm:$0xff] %v342_v15  ;;  %v340_v20 = vmin.f32 %v324_v16, 1.0  ;;  %v327_v21 = vmax.f32 %v500_v17, 0.0 }
 0x106   :  { %348 = vst [vmem:[%s641_s3 + $0x20] sm:$0xff] %v332_v12  ;;  %v335_v22 = vmin.f32 %v319_v18, 1.0  ;;  %v317_v23 = vmax.f32 %v502_v19, 0.0 }
 0x107   :  { %356 = vst [vmem:[%s641_s3 + $0x60] sm:$0xff] %v340_v20  ;;  %v343_v24 = vmin.f32 %v327_v21, 1.0 }
 0x108   :  { %351 = vst [vmem:[%s641_s3 + $0x38] sm:$0xff] %v335_v22  ;;  %v333_v25 = vmin.f32 %v317_v23, 1.0 }
 0x109   :  { %359 = vst [vmem:[%s641_s3 + $0x78] sm:$0xff] %v343_v24 }
 0x10a   :  { %v504_v26 = vpop.eup %503  ;;  %349 = vst [vmem:[%s641_s3 + $0x28] sm:$0xff] %v333_v25 }
 0x10b   :  { %v325_v27 = vmax.f32 %v504_v26, 0.0 }
 0x10d   :  { %v341_v28 = vmin.f32 %v325_v27, 1.0 }
 0x10f   :  { %357 = vst [vmem:[%s641_s3 + $0x68] sm:$0xff] %v341_v28 }

</bundles_post_ra>
